<compile_context>
chip_gen: v5e
topology: v5e:2x2
jax: 0.10.0
libtpu: 0.0.40
codegen_flags: <defaults>
</compile_context>

<pallas_src>
import functools

import jax
import jax.numpy as jnp
import numpy as np
from jax.experimental import pallas as pl
from jax.experimental.pallas import tpu as pltpu


def _round_up(v, m):
    return -(-v // m) * m


def _proj_groupnorm_kernel(x_ref, w_ref, bias_ref, gamma_ref, beta_ref, pool_ref,
                           o_ref,
                           sum_ref, sumsq_ref, scale_ref, shift_ref,
                           *, eps, n_rows):
    """Two-pass per sample: pass 0 accumulates stats, pass 1 normalizes + writes."""
    p = pl.program_id(1)                       # 0 = stats pass, 1 = write pass
    nt = pl.program_id(2)                      # spatial tile index
    last_nt = pl.num_programs(2) - 1

    # 1x1 conv WITHOUT bias == plain matmul over the channel dim (bias is folded into the
    # per-channel shift below).  Operands are fed in their native dtype (bf16 welcome on
    # v6e/v7x); accumulation is f32.
    proj = jnp.dot(x_ref[0], w_ref[...], preferred_element_type=jnp.float32)   # [T, H]

    # ---- pass 0: accumulate per-channel first/second moments ----------------------
    @pl.when(jnp.logical_and(p == 0, nt == 0))
    def _init():
        sum_ref[...] = jnp.zeros_like(sum_ref)
        sumsq_ref[...] = jnp.zeros_like(sumsq_ref)

    @pl.when(p == 0)
    def _accumulate():
        sum_ref[...] += jnp.sum(proj, axis=0, keepdims=True)
        sumsq_ref[...] += jnp.sum(proj * proj, axis=0, keepdims=True)

    @pl.when(jnp.logical_and(p == 0, nt == last_nt))
    def _finalize():
        n = jnp.float32(n_rows)                # true (unpadded) row count
        bias = bias_ref[...]                   # [1, H]
        s = sum_ref[...]
        ss = sumsq_ref[...]
        # Fold the conv bias into the moments of (proj + bias):
        s_b = s + n * bias
        ss_b = ss + 2.0 * bias * s + n * bias * bias
        # pool carries block-diagonal 1/(cg*N): a [1,H] @ [H,H] matmul broadcasts the
        # per-group mean / E[x^2] back to every channel of the group (no lane shuffles).
        mean = jnp.dot(s_b, pool_ref[...], preferred_element_type=jnp.float32)   # [1, H]
        ex2 = jnp.dot(ss_b, pool_ref[...], preferred_element_type=jnp.float32)   # [1, H]
        var = ex2 - mean * mean
        scale = gamma_ref[...] * jax.lax.rsqrt(var + jnp.float32(eps))
        scale_ref[...] = scale
        shift_ref[...] = beta_ref[...] + (bias - mean) * scale

    # ---- pass 1: single fused multiply-add over the tile, cast once at the store ---
    @pl.when(p == 1)
    def _normalize_and_write():
        o_ref[0] = (proj * scale_ref[...] + shift_ref[...]).astype(o_ref.dtype)


def project_level(x, w_t, bias, gamma, beta, *, num_groups=32, eps=1e-5,
                  out_dtype=None, block_rows=1024, vmem_limit_bytes=None):
    """Conv2d(C->H, 1x1) + GroupNorm(num_groups, H) on one channels-last level."""
    B, Y, X, C = x.shape
    H = w_t.shape[1]
    assert H % num_groups == 0, "hidden_dim must be divisible by num_groups"
    cg = H // num_groups
    N = Y * X
    out_dtype = x.dtype if out_dtype is None else jnp.dtype(out_dtype)

    # Spatial tiling: biggest tile <= block_rows (sublane-aligned).  For the usual
    # power-of-two FPN levels the tile divides N exactly; otherwise we zero-pad (zero
    # rows contribute exactly 0 to the bias-free sum / sum-of-squares, so stats stay
    # exact), and slice the padding back off the output.
    tile_n = min(int(block_rows), _round_up(N, 8))
    n_pad = _round_up(N, tile_n)
    n_tiles = n_pad // tile_n

    x_flat = x.reshape(B, N, C)
    if n_pad != N:
        x_flat = jnp.pad(x_flat, ((0, 0), (0, n_pad - N), (0, 0)))

    bias2 = bias.reshape(1, H).astype(jnp.float32)
    gamma2 = gamma.reshape(1, H).astype(jnp.float32)
    beta2 = beta.reshape(1, H).astype(jnp.float32)

    # pool[h1, h2] = 1/(cg*N) if h1, h2 share a group, else 0 (1/N folded in here).
    gid = jnp.arange(H) // cg
    pool = (gid[:, None] == gid[None, :]).astype(jnp.float32) / jnp.float32(cg * N)

    if vmem_limit_bytes is None:
        # Raise the scoped-VMEM ceiling above the conservative default; keep headroom
        # below physical capacity (64 MiB/TC on v7x, 128 MiB on v5e/v6e).
        try:
            phys = pltpu.get_tpu_info().vmem_capacity_bytes
        except Exception:
            phys = 64 * 1024 * 1024
        vmem_limit_bytes = min(96 * 1024 * 1024, int(phys) * 3 // 4)

    cost = pl.CostEstimate(
        flops=4 * B * n_pad * C * H,                           # matmul runs in both passes
        transcendentals=B * H,                                 # rsqrt per channel
        bytes_accessed=(2 * B * n_pad * C * x.dtype.itemsize   # input read twice
                        + B * n_pad * H * jnp.dtype(out_dtype).itemsize
                        + (C * H + H * H + 4 * H) * 4),
    )

    out_flat = pl.pallas_call(
        functools.partial(_proj_groupnorm_kernel, eps=float(eps), n_rows=N),
        out_shape=jax.ShapeDtypeStruct((B, n_pad, H), out_dtype),
        grid_spec=pltpu.PrefetchScalarGridSpec(
            num_scalar_prefetch=0,
            grid=(B, 2, n_tiles),
            in_specs=[
                pl.BlockSpec((1, tile_n, C), lambda b, p, n: (b, n, 0)),  # activations tile
                pl.BlockSpec((C, H), lambda b, p, n: (0, 0)),             # resident W^T
                pl.BlockSpec((1, H), lambda b, p, n: (0, 0)),             # resident conv bias
                pl.BlockSpec((1, H), lambda b, p, n: (0, 0)),             # resident GN gamma
                pl.BlockSpec((1, H), lambda b, p, n: (0, 0)),             # resident GN beta
                pl.BlockSpec((H, H), lambda b, p, n: (0, 0)),             # resident pool mat
            ],
            # Pass-0 steps pin the output index to block 0 of the sample, so no writeback
            # occurs until pass 1 has filled each block -> each block hits HBM exactly once.
            out_specs=pl.BlockSpec((1, tile_n, H), lambda b, p, n: (b, p * n, 0)),
            scratch_shapes=[pltpu.VMEM((1, H), jnp.float32)] * 4,  # sum, sumsq, scale, shift
        ),
        compiler_params=pltpu.CompilerParams(
            dimension_semantics=("parallel", "arbitrary", "arbitrary"),
            vmem_limit_bytes=int(vmem_limit_bytes),
        ),
        cost_estimate=cost,
    )(x_flat, w_t, bias2, gamma2, beta2, pool)

    if n_pad != N:
        out_flat = out_flat[:, :N, :]
    return out_flat.reshape(B, Y, X, H)


def feature_projector(feature_maps, params, *, num_groups=32, eps=1e-5,
                      out_dtype=None, block_rows=1024):
    """Per-level dispatch mirroring FeatureProjector.forward (one pallas_call per level)."""
    outs = []
    for x, (w_t, bias, gamma, beta) in zip(feature_maps, params):
        outs.append(project_level(x, w_t, bias, gamma, beta,
                                  num_groups=num_groups, eps=eps,
                                  out_dtype=out_dtype, block_rows=block_rows))
    return outs


def _reference_numpy(x, w_t, bias, gamma, beta, num_groups, eps=1e-5):
    """float64 numpy reference: 1x1 conv + GroupNorm, channels-last."""
    B, Y, X, C = x.shape
    H = w_t.shape[1]
    N = Y * X
    proj = x.reshape(B, N, C) @ w_t + bias
    g = proj.reshape(B, N, num_groups, H // num_groups)
    mean = g.mean(axis=(1, 3), keepdims=True)
    var = ((g - mean) ** 2).mean(axis=(1, 3), keepdims=True)
    norm = ((g - mean) / np.sqrt(var + eps)).reshape(B, N, H)
    out = norm * gamma + beta
    return out.reshape(B, Y, X, H)


if __name__ == "__main__":
    key = jax.random.PRNGKey(0)
    hidden_dim = 256           # module default; multiple of 128 -> lane-dense output
    num_groups = 32            # GroupNorm(32, hidden_dim)
    level_shapes = [(2, 16, 16, 4), (2, 8, 8, 8)]   # small feature pyramid (B, Y, X, C)

    feature_maps = []
    params = []
    for shp in level_shapes:
        key, k1, k2, k3, k4, k5 = jax.random.split(key, 6)
        C = shp[-1]
        feature_maps.append(jax.random.normal(k1, shp, dtype=jnp.float32))
        w_t = jax.random.normal(k2, (C, hidden_dim), dtype=jnp.float32) / np.sqrt(C)
        bias = 0.1 * jax.random.normal(k3, (hidden_dim,), dtype=jnp.float32)
        gamma = 1.0 + 0.1 * jax.random.normal(k4, (hidden_dim,), dtype=jnp.float32)
        beta = 0.1 * jax.random.normal(k5, (hidden_dim,), dtype=jnp.float32)
        params.append((w_t, bias, gamma, beta))

    refs = [
        _reference_numpy(
            np.asarray(x, np.float64), np.asarray(w_t, np.float64),
            np.asarray(b, np.float64), np.asarray(g, np.float64),
            np.asarray(bt, np.float64), num_groups)
        for x, (w_t, b, g, bt) in zip(feature_maps, params)
    ]

    # f32 output (exact module dtype); block_rows=128 exercises the multi-tile stats path.
    outs = feature_projector(feature_maps, params, num_groups=num_groups, block_rows=128)
    outs = [jax.block_until_ready(o) for o in outs]
    for out, ref in zip(outs, refs):
        np.testing.assert_allclose(np.asarray(out, np.float64), ref, rtol=5e-3, atol=5e-3)

    # bf16 output path: halves HBM write bytes on the write-bound store (looser tolerance).
    outs_bf16 = feature_projector(feature_maps, params, num_groups=num_groups,
                                  out_dtype=jnp.bfloat16, block_rows=128)
    outs_bf16 = [jax.block_until_ready(o) for o in outs_bf16]
    for out, ref in zip(outs_bf16, refs):
        np.testing.assert_allclose(np.asarray(out, np.float64), ref, rtol=2e-2, atol=2e-2)

    print("KERNEL_OK")
</pallas_src>

<mosaic_0001>
module attributes {stable_mosaic.version = 11 : i64} {
  func.func @_proj_groupnorm_kernel(%arg0: i32, %arg1: i32, %arg2: i32, %arg3: memref<1x128x4xf32, #tpu.memory_space<vmem>>, %arg4: memref<4x256xf32, #tpu.memory_space<vmem>>, %arg5: memref<1x256xf32, #tpu.memory_space<vmem>>, %arg6: memref<1x256xf32, #tpu.memory_space<vmem>>, %arg7: memref<1x256xf32, #tpu.memory_space<vmem>>, %arg8: memref<256x256xf32, #tpu.memory_space<vmem>>, %arg9: memref<1x128x256xf32, #tpu.memory_space<vmem>>, %arg10: memref<1x256xf32, #tpu.memory_space<vmem>>, %arg11: memref<1x256xf32, #tpu.memory_space<vmem>>, %arg12: memref<1x256xf32, #tpu.memory_space<vmem>>, %arg13: memref<1x256xf32, #tpu.memory_space<vmem>>) attributes {dimension_semantics = [#tpu.dimension_semantics<parallel>, #tpu.dimension_semantics<arbitrary>, #tpu.dimension_semantics<arbitrary>], iteration_bounds = array<i64: 2, 2, 2>, scalar_prefetch = 0 : i64, scratch_operands = 4 : i64, tpu.core_type = #tpu.core_type<tc>, window_params = [{transform_indices = @transform_0, window_bounds = array<i64: 1, 128, 4>}, {pipeline_mode = #tpu.pipeline_mode<synchronous>, transform_indices = @transform_1, window_bounds = array<i64: 4, 256>}, {pipeline_mode = #tpu.pipeline_mode<synchronous>, transform_indices = @transform_2, window_bounds = array<i64: 1, 256>}, {pipeline_mode = #tpu.pipeline_mode<synchronous>, transform_indices = @transform_3, window_bounds = array<i64: 1, 256>}, {pipeline_mode = #tpu.pipeline_mode<synchronous>, transform_indices = @transform_4, window_bounds = array<i64: 1, 256>}, {pipeline_mode = #tpu.pipeline_mode<synchronous>, transform_indices = @transform_5, window_bounds = array<i64: 256, 256>}, {transform_indices = @transform_6, window_bounds = array<i64: 1, 128, 256>}]} {
    %c0 = arith.constant 0 : index
    %c0_0 = arith.constant 0 : index
    %c0_1 = arith.constant 0 : index
    %0 = vector.load %arg3[%c0, %c0_0, %c0_1] : memref<1x128x4xf32, #tpu.memory_space<vmem>>, vector<1x128x4xf32>
    %1 = vector.shape_cast %0 : vector<1x128x4xf32> to vector<128x4xf32>
    %c0_2 = arith.constant 0 : index
    %c0_3 = arith.constant 0 : index
    %2 = vector.load %arg4[%c0_2, %c0_3] : memref<4x256xf32, #tpu.memory_space<vmem>>, vector<4x256xf32>
    %cst = arith.constant dense<0.000000e+00> : vector<128x256xf32>
    %3 = tpu.matmul %1, %2, %cst {dimension_numbers = #tpu.dot_dimension_numbers<[1], [0], [0], [1], [0, 0, 1, 1], [], []>} : vector<128x4xf32>, vector<4x256xf32>, vector<128x256xf32> -> vector<128x256xf32>
    %c0_i32 = arith.constant 0 : i32
    %4 = arith.cmpi eq, %arg1, %c0_i32 : i32
    %c0_i32_4 = arith.constant 0 : i32
    %5 = arith.cmpi eq, %arg2, %c0_i32_4 : i32
    %6 = arith.andi %4, %5 : i1
    %7 = arith.extui %6 : i1 to i32
    %c0_i32_5 = arith.constant 0 : i32
    %8 = arith.cmpi ne, %7, %c0_i32_5 : i32
    scf.if %8 {
      %cst_12 = arith.constant 0.000000e+00 : f32
      %20 = vector.broadcast %cst_12 : f32 to vector<1x256xf32>
      %c0_13 = arith.constant 0 : index
      %c0_14 = arith.constant 0 : index
      %21 = vector.load %arg10[%c0_13, %c0_14] : memref<1x256xf32, #tpu.memory_space<vmem>>, vector<1x256xf32>
      tpu.vector_store %arg10[%c0_13, %c0_14], %20 {strides = array<i32>} : memref<1x256xf32, #tpu.memory_space<vmem>>, vector<1x256xf32>,
      %cst_15 = arith.constant 0.000000e+00 : f32
      %22 = vector.broadcast %cst_15 : f32 to vector<1x256xf32>
      %c0_16 = arith.constant 0 : index
      %c0_17 = arith.constant 0 : index
      %23 = vector.load %arg11[%c0_16, %c0_17] : memref<1x256xf32, #tpu.memory_space<vmem>>, vector<1x256xf32>
      tpu.vector_store %arg11[%c0_16, %c0_17], %22 {strides = array<i32>} : memref<1x256xf32, #tpu.memory_space<vmem>>, vector<1x256xf32>,
    } else {
    }
    %c0_i32_6 = arith.constant 0 : i32
    %9 = arith.cmpi eq, %arg1, %c0_i32_6 : i32
    %10 = arith.extui %9 : i1 to i32
    %c0_i32_7 = arith.constant 0 : i32
    %11 = arith.cmpi ne, %10, %c0_i32_7 : i32
    scf.if %11 {
      %c0_12 = arith.constant 0 : index
      %c0_13 = arith.constant 0 : index
      %20 = vector.load %arg10[%c0_12, %c0_13] : memref<1x256xf32, #tpu.memory_space<vmem>>, vector<1x256xf32>
      %cst_14 = arith.constant dense<0.000000e+00> : vector<256xf32>
      %21 = vector.multi_reduction <add>, %3, %cst_14 [0] : vector<128x256xf32> to vector<256xf32>
      %22 = vector.shape_cast %21 : vector<256xf32> to vector<1x256xf32>
      %23 = arith.addf %20, %22 : vector<1x256xf32>
      %c0_15 = arith.constant 0 : index
      %c0_16 = arith.constant 0 : index
      %24 = vector.load %arg10[%c0_15, %c0_16] : memref<1x256xf32, #tpu.memory_space<vmem>>, vector<1x256xf32>
      tpu.vector_store %arg10[%c0_15, %c0_16], %23 {strides = array<i32>} : memref<1x256xf32, #tpu.memory_space<vmem>>, vector<1x256xf32>,
      %c0_17 = arith.constant 0 : index
      %c0_18 = arith.constant 0 : index
      %25 = vector.load %arg11[%c0_17, %c0_18] : memref<1x256xf32, #tpu.memory_space<vmem>>, vector<1x256xf32>
      %26 = arith.mulf %3, %3 : vector<128x256xf32>
      %cst_19 = arith.constant dense<0.000000e+00> : vector<256xf32>
      %27 = vector.multi_reduction <add>, %26, %cst_19 [0] : vector<128x256xf32> to vector<256xf32>
      %28 = vector.shape_cast %27 : vector<256xf32> to vector<1x256xf32>
      %29 = arith.addf %25, %28 : vector<1x256xf32>
      %c0_20 = arith.constant 0 : index
      %c0_21 = arith.constant 0 : index
      %30 = vector.load %arg11[%c0_20, %c0_21] : memref<1x256xf32, #tpu.memory_space<vmem>>, vector<1x256xf32>
      tpu.vector_store %arg11[%c0_20, %c0_21], %29 {strides = array<i32>} : memref<1x256xf32, #tpu.memory_space<vmem>>, vector<1x256xf32>,
    } else {
    }
    %c0_i32_8 = arith.constant 0 : i32
    %12 = arith.cmpi eq, %arg1, %c0_i32_8 : i32
    %c1_i32 = arith.constant 1 : i32
    %13 = arith.cmpi eq, %arg2, %c1_i32 : i32
    %14 = arith.andi %12, %13 : i1
    %15 = arith.extui %14 : i1 to i32
    %c0_i32_9 = arith.constant 0 : i32
    %16 = arith.cmpi ne, %15, %c0_i32_9 : i32
    scf.if %16 {
      %c0_12 = arith.constant 0 : index
      %c0_13 = arith.constant 0 : index
      %20 = vector.load %arg5[%c0_12, %c0_13] : memref<1x256xf32, #tpu.memory_space<vmem>>, vector<1x256xf32>
      %c0_14 = arith.constant 0 : index
      %c0_15 = arith.constant 0 : index
      %21 = vector.load %arg10[%c0_14, %c0_15] : memref<1x256xf32, #tpu.memory_space<vmem>>, vector<1x256xf32>
      %c0_16 = arith.constant 0 : index
      %c0_17 = arith.constant 0 : index
      %22 = vector.load %arg11[%c0_16, %c0_17] : memref<1x256xf32, #tpu.memory_space<vmem>>, vector<1x256xf32>
      %cst_18 = arith.constant 2.560000e+02 : f32
      %23 = vector.broadcast %cst_18 : f32 to vector<1x256xf32>
      %24 = arith.mulf %23, %20 : vector<1x256xf32>
      %25 = arith.addf %21, %24 : vector<1x256xf32>
      %cst_19 = arith.constant 2.000000e+00 : f32
      %26 = vector.broadcast %cst_19 : f32 to vector<1x256xf32>
      %27 = arith.mulf %26, %20 : vector<1x256xf32>
      %28 = arith.mulf %27, %21 : vector<1x256xf32>
      %29 = arith.addf %22, %28 : vector<1x256xf32>
      %cst_20 = arith.constant 2.560000e+02 : f32
      %30 = vector.broadcast %cst_20 : f32 to vector<1x256xf32>
      %31 = arith.mulf %30, %20 : vector<1x256xf32>
      %32 = arith.mulf %31, %20 : vector<1x256xf32>
      %33 = arith.addf %29, %32 : vector<1x256xf32>
      %c0_21 = arith.constant 0 : index
      %c0_22 = arith.constant 0 : index
      %34 = vector.load %arg8[%c0_21, %c0_22] : memref<256x256xf32, #tpu.memory_space<vmem>>, vector<256x256xf32>
      %cst_23 = arith.constant dense<0.000000e+00> : vector<1x256xf32>
      %35 = tpu.matmul %25, %34, %cst_23 {dimension_numbers = #tpu.dot_dimension_numbers<[1], [0], [0], [1], [0, 0, 1, 1], [], []>} : vector<1x256xf32>, vector<256x256xf32>, vector<1x256xf32> -> vector<1x256xf32>
      %c0_24 = arith.constant 0 : index
      %c0_25 = arith.constant 0 : index
      %36 = vector.load %arg8[%c0_24, %c0_25] : memref<256x256xf32, #tpu.memory_space<vmem>>, vector<256x256xf32>
      %cst_26 = arith.constant dense<0.000000e+00> : vector<1x256xf32>
      %37 = tpu.matmul %33, %36, %cst_26 {dimension_numbers = #tpu.dot_dimension_numbers<[1], [0], [0], [1], [0, 0, 1, 1], [], []>} : vector<1x256xf32>, vector<256x256xf32>, vector<1x256xf32> -> vector<1x256xf32>
      %38 = arith.mulf %35, %35 : vector<1x256xf32>
      %39 = arith.subf %37, %38 : vector<1x256xf32>
      %c0_27 = arith.constant 0 : index
      %c0_28 = arith.constant 0 : index
      %40 = vector.load %arg6[%c0_27, %c0_28] : memref<1x256xf32, #tpu.memory_space<vmem>>, vector<1x256xf32>
      %cst_29 = arith.constant 9.99999974E-6 : f32
      %41 = vector.broadcast %cst_29 : f32 to vector<1x256xf32>
      %42 = arith.addf %39, %41 : vector<1x256xf32>
      %43 = math.rsqrt %42 : vector<1x256xf32>
      %44 = arith.mulf %40, %43 : vector<1x256xf32>
      %c0_30 = arith.constant 0 : index
      %c0_31 = arith.constant 0 : index
      %45 = vector.load %arg12[%c0_30, %c0_31] : memref<1x256xf32, #tpu.memory_space<vmem>>, vector<1x256xf32>
      tpu.vector_store %arg12[%c0_30, %c0_31], %44 {strides = array<i32>} : memref<1x256xf32, #tpu.memory_space<vmem>>, vector<1x256xf32>,
      %c0_32 = arith.constant 0 : index
      %c0_33 = arith.constant 0 : index
      %46 = vector.load %arg7[%c0_32, %c0_33] : memref<1x256xf32, #tpu.memory_space<vmem>>, vector<1x256xf32>
      %47 = arith.subf %20, %35 : vector<1x256xf32>
      %48 = arith.mulf %47, %44 : vector<1x256xf32>
      %49 = arith.addf %46, %48 : vector<1x256xf32>
      %c0_34 = arith.constant 0 : index
      %c0_35 = arith.constant 0 : index
      %50 = vector.load %arg13[%c0_34, %c0_35] : memref<1x256xf32, #tpu.memory_space<vmem>>, vector<1x256xf32>
      tpu.vector_store %arg13[%c0_34, %c0_35], %49 {strides = array<i32>} : memref<1x256xf32, #tpu.memory_space<vmem>>, vector<1x256xf32>,
    } else {
    }
    %c1_i32_10 = arith.constant 1 : i32
    %17 = arith.cmpi eq, %arg1, %c1_i32_10 : i32
    %18 = arith.extui %17 : i1 to i32
    %c0_i32_11 = arith.constant 0 : i32
    %19 = arith.cmpi ne, %18, %c0_i32_11 : i32
    scf.if %19 {
      %c0_12 = arith.constant 0 : index
      %c0_13 = arith.constant 0 : index
      %20 = vector.load %arg12[%c0_12, %c0_13] : memref<1x256xf32, #tpu.memory_space<vmem>>, vector<1x256xf32>
      %21 = vector.broadcast %20 : vector<1x256xf32> to vector<128x256xf32>
      %22 = arith.mulf %3, %21 : vector<128x256xf32>
      %c0_14 = arith.constant 0 : index
      %c0_15 = arith.constant 0 : index
      %23 = vector.load %arg13[%c0_14, %c0_15] : memref<1x256xf32, #tpu.memory_space<vmem>>, vector<1x256xf32>
      %24 = vector.broadcast %23 : vector<1x256xf32> to vector<128x256xf32>
      %25 = arith.addf %22, %24 : vector<128x256xf32>
      %c0_16 = arith.constant 0 : index
      %c0_17 = arith.constant 0 : index
      %c0_18 = arith.constant 0 : index
      %26 = vector.load %arg9[%c0_16, %c0_17, %c0_18] : memref<1x128x256xf32, #tpu.memory_space<vmem>>, vector<1x128x256xf32>
      %27 = vector.shape_cast %26 : vector<1x128x256xf32> to vector<128x256xf32>
      %28 = vector.shape_cast %25 : vector<128x256xf32> to vector<1x128x256xf32>
      tpu.vector_store %arg9[%c0_16, %c0_17, %c0_18], %28 {strides = array<i32>} : memref<1x128x256xf32, #tpu.memory_space<vmem>>, vector<1x128x256xf32>,
    } else {
    }
    return
  }
  func.func @transform_0(%arg0: i32, %arg1: i32, %arg2: i32) -> (i32, i32, i32) {
    %c0_i32 = arith.constant 0 : i32
    %c0_i32_0 = arith.constant 0 : i32
    return %arg0, %arg2, %c0_i32 : i32, i32, i32
  }
  func.func @transform_1(%arg0: i32, %arg1: i32, %arg2: i32) -> (i32, i32) {
    %c0_i32 = arith.constant 0 : i32
    %c0_i32_0 = arith.constant 0 : i32
    %c0_i32_1 = arith.constant 0 : i32
    return %c0_i32, %c0_i32_0 : i32, i32
  }
  func.func @transform_2(%arg0: i32, %arg1: i32, %arg2: i32) -> (i32, i32) {
    %c0_i32 = arith.constant 0 : i32
    %c0_i32_0 = arith.constant 0 : i32
    %c0_i32_1 = arith.constant 0 : i32
    return %c0_i32, %c0_i32_0 : i32, i32
  }
  func.func @transform_3(%arg0: i32, %arg1: i32, %arg2: i32) -> (i32, i32) {
    %c0_i32 = arith.constant 0 : i32
    %c0_i32_0 = arith.constant 0 : i32
    %c0_i32_1 = arith.constant 0 : i32
    return %c0_i32, %c0_i32_0 : i32, i32
  }
  func.func @transform_4(%arg0: i32, %arg1: i32, %arg2: i32) -> (i32, i32) {
    %c0_i32 = arith.constant 0 : i32
    %c0_i32_0 = arith.constant 0 : i32
    %c0_i32_1 = arith.constant 0 : i32
    return %c0_i32, %c0_i32_0 : i32, i32
  }
  func.func @transform_5(%arg0: i32, %arg1: i32, %arg2: i32) -> (i32, i32) {
    %c0_i32 = arith.constant 0 : i32
    %c0_i32_0 = arith.constant 0 : i32
    %c0_i32_1 = arith.constant 0 : i32
    return %c0_i32, %c0_i32_0 : i32, i32
  }
  func.func @transform_6(%arg0: i32, %arg1: i32, %arg2: i32) -> (i32, i32, i32) {
    %0 = arith.muli %arg1, %arg2 : i32
    %c0_i32 = arith.constant 0 : i32
    %c0_i32_0 = arith.constant 0 : i32
    return %arg0, %0, %c0_i32 : i32, i32, i32
  }
}

</mosaic_0001>

<bundles_post_ra>
// kernel: tpu_custom_call.1
= control target key start
LH: loop header
LB: loop body
LE: loop exit
PB: predicated region body
PF: predicated region fallthrough
CT: control target
= control target key end

     0   :  { %s2448_s0 = inlined_call_operand.vmem [shape: f32[2,256,4], index: 0, kind: input, shape index: {}]   ;;  %s2449_s1 = inlined_call_operand.vmem [shape: f32[4,256], index: 1, kind: input, shape index: {}]   ;;  %s2450_s2 = inlined_call_operand.vmem [shape: f32[1,256], index: 2, kind: input, shape index: {}]   ;;  %s2451_s3 = inlined_call_operand.vmem [shape: f32[1,256], index: 3, kind: input, shape index: {}]   ;;  %s2452_s4 = inlined_call_operand.vmem [shape: f32[1,256], index: 4, kind: input, shape index: {}]   ;;  %s2453_s5 = inlined_call_operand.vmem [shape: f32[256,256], index: 5, kind: input, shape index: {}]   ;;  %s2454_s6 = inlined_call_operand.hbm [shape: f32[2,256,256], index: 6, kind: output, shape index: {}]  }
   0x1   :  { %2490 = sst [smem:[#allocation43_spill]] %s2448_s0 }
   0x2   :  { %2491 = sst [smem:[#allocation44_spill]] %s2449_s1 }
   0x3   :  { %2492 = sst [smem:[#allocation45_spill]] %s2450_s2 }
   0x4   :  { %2493 = sst [smem:[#allocation46_spill]] %s2451_s3 }
   0x5   :  { %2494 = sst [smem:[#allocation47_spill]] %s2452_s4 }
   0x6   :  { %11 = vsyncpa [#allocation7], 0 }
   0x7   :  { %13 = vsyncpa [#allocation7 + $0x1], 0  ;;  %s1465_s21 = smov 0   ;;  %s1467_s22 = smov 0  }
   0x8   :  { %s1469_s23 = smov 0   ;;  %s1471_s24 = smov 0  }
   0x9   :  { %s1473_s25 = smov 0   ;;  %s1475_s26 = smov 0  }
   0xa   :  { %s1477_s27 = smov 0   ;;  %s1479_s28 = smov 0  }
   0xb   :  { %s1481_s29 = smov 0   ;;  %s1483_s30 = smov 0  }
   0xc LB: > { %s1166_s7 = sadd.s32 4294967295, %s1425_s30   ;;  %s1167_s8 = sadd.s32 4294967294, %s1425_s30   ;;  %s1425_s30 = sphi %s1483_s30, %s19_s30   ;;  %s1421_s29 = sphi %s1481_s29, %s2580_s29   ;;  %s1417_s28 = sphi %s1479_s28, %s2579_s28   ;;  %s1413_s27 = sphi %s1477_s27, %s2578_s27   ;;  %s1409_s26 = sphi %s1475_s26, %s2577_s26   ;;  %s1405_s25 = sphi %s1473_s25, %s2576_s25   ;;  %s1401_s24 = sphi %s1471_s24, %s2575_s24   ;;  %s1397_s23 = sphi %s1469_s23, %s2574_s23   ;;  %s1393_s22 = sphi %s1467_s22, %s2573_s22   ;;  %s1389_s21 = sphi %s1465_s21, %s2572_s21  }
   0xd   : > { %s31_s9 = sadd.s32 1, %s1413_s27  ;;  %s34_s10 = sadd.s32 1, %s1417_s28 }
   0xe   : > { %p32_p0 = scmp.ge.s32.totalorder %s31_s9, 2  ;;  %s38_s11 = sadd.s32 1, %s1421_s29 }
   0xf   : > { %s175_s12 = smul.u32 %s1413_s27, %s1417_s28  ;;  %p192_p1 = scmp.ne.s32.totalorder %s1397_s23, %s1393_s22 }
  0x10   : > { %s2582_s9 = smov (%p32_p0, %s31_s9), 0  ;;  %s2584_s10 = smov (!%p32_p0, %s34_s10), %s1417_s28 }
  0x11   : > { %p193_p2 = scmp.eq.s32.totalorder %s1166_s7, 7  ;;  %p36_p3 = scmp.ge.s32.totalorder %s2584_s10, 2 }
  0x12   : > { %p198_p4 = scmp.ne.s32.totalorder %s1393_s22, %s1389_s21  ;;  %p199_p6 = scmp.eq.s32.totalorder %s1167_s8, 7 }
  0x13   : > { %p1529_p5 = por %p193_p2, %p192_p1  ;;  %s2586_s10 = smov (%p36_p3, %s2584_s10), 0 }
  0x14   : > { %2496 = sst [smem:[#allocation9_spill]] %s2586_s10  ;;  %s2588_s11 = smov (!%p36_p3, %s38_s11), %s1421_s29 }
  0x15   : > { %s176_s14 = smul.u32 %s2586_s10, %s2582_s9  ;;  %p1538_p7 = por %p199_p6, %p198_p4 }
  0x16   : > { %p40_p8 = scmp.ge.s32.totalorder %s2588_s11, 2  ;;  %p1170_p9 = scmp.ge.s32.totalorder %s1425_s30, 1 }
  0x17   : > { %s178_s16 = ssub.s32 %s175_s12, %s176_s14  ;;  %p245_p10 = scmp.lt.s32.totalorder %s1425_s30, 9 }
  0x18   : > { %s2590_s11 = smov (%p40_p8, %s2588_s11), 0  ;;  %s182_s19 = sadd.s32 1, %s1397_s23 }
  0x19   : > { %2498 = sst [smem:[#allocation10_spill]] %s2590_s11  ;;  %p246_p11 = pnand %p1170_p9, %p245_p10 }
  0x1a   : > { %s177_s17 = ssub.s32 %s1421_s29, %s2590_s11 }
  0x1b   : > { %s179_s18 = sor.u32 %s178_s16, %s177_s17  ;;  %249 = sbr.rel (%p246_p11) target bundleno = 610 (0x262), region = 44 }
  0x1c   : > { %p180_p12 = scmp.eq.s32.totalorder %s179_s18, 0 }
  0x1e   : > { %s1550_s20 = scalar_select %p180_p12, %s1397_s23, %s182_s19  }
  0x20   : > { %s2499_s1 = sld [smem:[#allocation44_spill]]  ;;  %s1172_s12 = sshll.u32 %s1401_s24, 4  ;;  %vm361_vm0 = vcmask 1043456   ;;  %vm312_vm1 = vcmask 31744  }
  0x21   : > { %p280_p13 = scmp.lt.s32.totalorder %s1409_s26, 1  ;;  %p282_p0 = scmp.lt.s32.totalorder %s1172_s12, 31 }
  0x22   : > { %s2489_s14 = sand.u32 1, %s1393_s22   ;;  %s2500_s0 = sld [smem:[#allocation43_spill]] }
  0x23   : > { %s281_s16 = scalar_select %p280_p13, %s1409_s26, 1 }
  0x24   : > { %s2592_s12 = smov (!%p282_p0, %s1172_s12), 31  ;;  %s1561_s18 = sshll.u32 %s2489_s14, 8 }
  0x25   : > { %s1173_s17 = sshll.u32 %s281_s16, 5  ;;  %p496_p1 = scmp.eq.s32.totalorder %s1405_s25, 0 }
  0x26   : > { %v307_v0 = vld [vmem:[%s2499_s1] sm:$0xff]  ;;  %s285_s19 = sadd.s32 %s1173_s17, %s2592_s12  ;;  %p497_p2 = scmp.eq.s32.totalorder %s1401_s24, 0 }
  0x27   : > { %309 = vst [vmem:[#allocation1] ss:$2 sm:$0xff] %v307_v0  ;;  %s1174_s7 = sshll.u32 %s285_s19, 3 }
  0x28   : > { %s1566_s10 = scalar_lea.vmem %s2500_s0, %s1174_s7  ;;  %p1620_p3 = pnand %p497_p2, %p496_p1 }
  0x29   : > { %v299_v3 = vld [vmem:[%s1566_s10 + $0x40] sm:$0xff]  ;;  %v300_v5 = vld [vmem:[%s1566_s10 + $0x48] sm:$0xff]  ;;  %v301_v7 = vld [vmem:[%s1566_s10 + $0x50] sm:$0xff] }
  0x2a   : > { %v291_v4 = vld [vmem:[%s1566_s10] sm:$0xff]  ;;  %v292_v6 = vld [vmem:[%s1566_s10 + $0x8] sm:$0xff]  ;;  %v293_v8 = vld [vmem:[%s1566_s10 + $0x10] sm:$0xff] }
  0x2b   : > { %v302_v9 = vld [vmem:[%s1566_s10 + $0x58] sm:$0xff]  ;;  %v303_v11 = vld [vmem:[%s1566_s10 + $0x60] sm:$0xff]  ;;  %v304_v13 = vld [vmem:[%s1566_s10 + $0x68] sm:$0xff] }
  0x2c   : > { %v294_v10 = vld [vmem:[%s1566_s10 + $0x18] sm:$0xff]  ;;  %v295_v12 = vld [vmem:[%s1566_s10 + $0x20] sm:$0xff]  ;;  %v296_v14 = vld [vmem:[%s1566_s10 + $0x28] sm:$0xff] }
  0x2d   : > { %v305_v15 = vld [vmem:[%s1566_s10 + $0x70] sm:$0xff]  ;;  %v306_v17 = vld [vmem:[%s1566_s10 + $0x78] sm:$0xff] }
  0x2e   : > { %v310_v1 = vld.sshfl [vmem:[#allocation1] sm:$0xff pattern:$0x75316420]  ;;  %v311_v2 = vld.sshfl [vmem:[#allocation1 + $0x8] sm:$0xff pattern:$0x75316420] }
  0x2f   : > { %1219 = vmatpush.msk.msra.mxu2 %vm361_vm0, %v310_v1  ;;  %1220 = vmatpush.msk.msra.mxu3 %vm361_vm0, %v311_v2  ;;  %v297_v16 = vld [vmem:[%s1566_s10 + $0x30] sm:$0xff]  ;;  %v298_v18 = vld [vmem:[%s1566_s10 + $0x38] sm:$0xff]  ;;  %s1689_s10 = scalar_lea.vmem [#allocation6], %s1561_s18 }
  0x30   : > { %1184 = vmatmul.msk.f32.vlgmr.msra.gmra.mxu2 %vm312_vm1, %v299_v3  ;;  %1201 = vmatmul.msk.f32.vlgmr.msra.gmra.mxu3 %vm312_vm1, %v299_v3 }
  0x31   : > { %1175 = vmatpush.msk.msra.mxu0 %vm361_vm0, %v310_v1  ;;  %1192 = vmatpush.msk.msra.mxu1 %vm361_vm0, %v311_v2 }
  0x32   : > { %1176 = vmatmul.msk.f32.vlgmr.msra.gmra.mxu0 %vm312_vm1, %v291_v4  ;;  %1193 = vmatmul.msk.f32.vlgmr.msra.gmra.mxu1 %vm312_vm1, %v291_v4 }
  0x38   : > { %1185 = vmatmul.msk.f32.gmra.mxu2 %vm312_vm1, %v300_v5  ;;  %1202 = vmatmul.msk.f32.gmra.mxu3 %vm312_vm1, %v300_v5 }
  0x3a   : > { %1177 = vmatmul.msk.f32.gmra.mxu0 %vm312_vm1, %v292_v6  ;;  %1194 = vmatmul.msk.f32.gmra.mxu1 %vm312_vm1, %v292_v6 }
  0x40   : > { %1186 = vmatmul.msk.f32.gmra.mxu2 %vm312_vm1, %v301_v7  ;;  %1203 = vmatmul.msk.f32.gmra.mxu3 %vm312_vm1, %v301_v7 }
  0x42   : > { %1178 = vmatmul.msk.f32.gmra.mxu0 %vm312_vm1, %v293_v8  ;;  %1195 = vmatmul.msk.f32.gmra.mxu1 %vm312_vm1, %v293_v8 }
  0x48   : > { %1187 = vmatmul.msk.f32.gmra.mxu2 %vm312_vm1, %v302_v9  ;;  %1204 = vmatmul.msk.f32.gmra.mxu3 %vm312_vm1, %v302_v9 }
  0x4a   : > { %1179 = vmatmul.msk.f32.gmra.mxu0 %vm312_vm1, %v294_v10  ;;  %1196 = vmatmul.msk.f32.gmra.mxu1 %vm312_vm1, %v294_v10 }
  0x50   : > { %1188 = vmatmul.msk.f32.gmra.mxu2 %vm312_vm1, %v303_v11  ;;  %1205 = vmatmul.msk.f32.gmra.mxu3 %vm312_vm1, %v303_v11 }
  0x52   : > { %1180 = vmatmul.msk.f32.gmra.mxu0 %vm312_vm1, %v295_v12  ;;  %1197 = vmatmul.msk.f32.gmra.mxu1 %vm312_vm1, %v295_v12 }
  0x58   : > { %1189 = vmatmul.msk.f32.gmra.mxu2 %vm312_vm1, %v304_v13  ;;  %1206 = vmatmul.msk.f32.gmra.mxu3 %vm312_vm1, %v304_v13 }
  0x5a   : > { %1181 = vmatmul.msk.f32.gmra.mxu0 %vm312_vm1, %v296_v14  ;;  %1198 = vmatmul.msk.f32.gmra.mxu1 %vm312_vm1, %v296_v14 }
  0x60   : > { %1190 = vmatmul.msk.f32.gmra.mxu2 %vm312_vm1, %v305_v15  ;;  %1207 = vmatmul.msk.f32.gmra.mxu3 %vm312_vm1, %v305_v15 }
  0x62   : > { %1182 = vmatmul.msk.f32.gmra.mxu0 %vm312_vm1, %v297_v16  ;;  %1199 = vmatmul.msk.f32.gmra.mxu1 %vm312_vm1, %v297_v16 }
  0x68   : > { %1191 = vmatmul.msk.f32.gmra.mxu2 %vm312_vm1, %v306_v17  ;;  %1208 = vmatmul.msk.f32.gmra.mxu3 %vm312_vm1, %v306_v17 }
  0x6a   : > { %1183 = vmatmul.msk.f32.gmra.mxu0 %vm312_vm1, %v298_v18  ;;  %1200 = vmatmul.msk.f32.gmra.mxu1 %vm312_vm1, %v298_v18 }
  0xaf   : > { %v1624_v19 = vpop.f32.mrf.mxu0  ;;  %v1626_v20 = vpop.f32.mrf.mxu1 }
  0xb0   : > { %2502 = vst [vmem:[#allocation11_spill] sm:$0xff] %v1624_v19 }
  0xb1   : > { %2503 = vst [vmem:[#allocation12_spill] sm:$0xff] %v1626_v20 }
  0xb3   : > { %v1628_v21 = vpop.f32.mrf.mxu2  ;;  %v1630_v22 = vpop.f32.mrf.mxu3 }
  0xb4   : > { %2504 = vst [vmem:[#allocation13_spill] sm:$0xff] %v1628_v21 }
  0xb5   : > { %2505 = vst [vmem:[#allocation14_spill] sm:$0xff] %v1630_v22 }
  0xb7   : > { %v1632_v23 = vpop.f32.mrf.mxu0  ;;  %v1634_v24 = vpop.f32.mrf.mxu1 }
  0xb8   : > { %2506 = vst [vmem:[#allocation15_spill] sm:$0xff] %v1632_v23 }
  0xb9   : > { %2507 = vst [vmem:[#allocation16_spill] sm:$0xff] %v1634_v24 }
  0xbb   : > { %v1636_v25 = vpop.f32.mrf.mxu2  ;;  %v1638_v26 = vpop.f32.mrf.mxu3 }
  0xbc   : > { %2508 = vst [vmem:[#allocation17_spill] sm:$0xff] %v1636_v25 }
  0xbd   : > { %2509 = vst [vmem:[#allocation18_spill] sm:$0xff] %v1638_v26 }
  0xbf   : > { %v1640_v27 = vpop.f32.mrf.mxu0  ;;  %v1642_v28 = vpop.f32.mrf.mxu1 }
  0xc0   : > { %2510 = vst [vmem:[#allocation19_spill] sm:$0xff] %v1640_v27 }
  0xc1   : > { %2511 = vst [vmem:[#allocation20_spill] sm:$0xff] %v1642_v28 }
  0xc3   : > { %v1644_v29 = vpop.f32.mrf.mxu2  ;;  %v1646_v30 = vpop.f32.mrf.mxu3 }
  0xc4   : > { %2512 = vst [vmem:[#allocation21_spill] sm:$0xff] %v1644_v29 }
  0xc5   : > { %2513 = vst [vmem:[#allocation22_spill] sm:$0xff] %v1646_v30 }
  0xc7   : > { %v1648_v31 = vpop.f32.mrf.mxu0  ;;  %v1650_v32 = vpop.f32.mrf.mxu1 }
  0xc8   : > { %2514 = vst [vmem:[#allocation23_spill] sm:$0xff] %v1648_v31 }
  0xc9   : > { %2515 = vst [vmem:[#allocation24_spill] sm:$0xff] %v1650_v32 }
  0xcb   : > { %v1652_v33 = vpop.f32.mrf.mxu2  ;;  %v1654_v34 = vpop.f32.mrf.mxu3 }
  0xcc   : > { %2516 = vst [vmem:[#allocation25_spill] sm:$0xff] %v1652_v33 }
  0xcd   : > { %2517 = vst [vmem:[#allocation26_spill] sm:$0xff] %v1654_v34 }
  0xcf   : > { %v1656_v35 = vpop.f32.mrf.mxu0  ;;  %v1658_v36 = vpop.f32.mrf.mxu1 }
  0xd0   : > { %2518 = vst [vmem:[#allocation27_spill] sm:$0xff] %v1656_v35 }
  0xd1   : > { %2519 = vst [vmem:[#allocation28_spill] sm:$0xff] %v1658_v36 }
  0xd3   : > { %v1660_v37 = vpop.f32.mrf.mxu2  ;;  %v1662_v38 = vpop.f32.mrf.mxu3 }
  0xd4   : > { %2520 = vst [vmem:[#allocation29_spill] sm:$0xff] %v1660_v37 }
  0xd5   : > { %2521 = vst [vmem:[#allocation30_spill] sm:$0xff] %v1662_v38 }
  0xd7   : > { %v1664_v39 = vpop.f32.mrf.mxu0  ;;  %v1666_v40 = vpop.f32.mrf.mxu1 }
  0xd8   : > { %2522 = vst [vmem:[#allocation31_spill] sm:$0xff] %v1664_v39 }
  0xd9   : > { %2523 = vst [vmem:[#allocation32_spill] sm:$0xff] %v1666_v40 }
  0xdb   : > { %v1668_v41 = vpop.f32.mrf.mxu2  ;;  %v1670_v42 = vpop.f32.mrf.mxu3 }
  0xdc   : > { %2524 = vst [vmem:[#allocation33_spill] sm:$0xff] %v1668_v41 }
  0xdd   : > { %2525 = vst [vmem:[#allocation34_spill] sm:$0xff] %v1670_v42 }
  0xdf   : > { %v1672_v43 = vpop.f32.mrf.mxu0  ;;  %v1674_v44 = vpop.f32.mrf.mxu1 }
  0xe0   : > { %2526 = vst [vmem:[#allocation35_spill] sm:$0xff] %v1672_v43 }
  0xe1   : > { %2527 = vst [vmem:[#allocation36_spill] sm:$0xff] %v1674_v44 }
  0xe3   : > { %v1676_v45 = vpop.f32.mrf.mxu2  ;;  %v1678_v46 = vpop.f32.mrf.mxu3 }
  0xe4   : > { %2528 = vst [vmem:[#allocation37_spill] sm:$0xff] %v1676_v45 }
  0xe5   : > { %2529 = vst [vmem:[#allocation38_spill] sm:$0xff] %v1678_v46 }
  0xe7   : > { %v1680_v47 = vpop.f32.mrf.mxu0  ;;  %v1682_v48 = vpop.f32.mrf.mxu1 }
  0xe8   : > { %2530 = vst [vmem:[#allocation39_spill] sm:$0xff] %v1680_v47 }
  0xe9   : > { %2531 = vst [vmem:[#allocation40_spill] sm:$0xff] %v1682_v48  ;;  %501 = sbr.rel (%p1620_p3) target bundleno = 243 (0xf3), region = 48 }
  0xeb   : > { %v1684_v49 = vpop.f32.mrf.mxu2  ;;  %v1686_v50 = vpop.f32.mrf.mxu3 }
  0xec   : > { %2532 = vst [vmem:[#allocation41_spill] sm:$0xff] %v1684_v49 }
  0xed   : > { %2533 = vst [vmem:[#allocation42_spill] sm:$0xff] %v1686_v50 }
  0xee   : > { %v502_v51 = vlaneseq  ;;  %v1427_v52 = vmov 0.0  }
  0xf0   : > { %vm504_vm2 = vcmp.lt.s32.totalorder %v502_v51, 256 }
  0xf1   : > { %506 = vst.msk [vmem:[#allocation2] sm:$0x3] %vm504_vm2, %v1427_v52 }
  0xf2   : > { %507 = vst.msk [vmem:[#allocation3] sm:$0x3] %vm504_vm2, %v1427_v52 }
  0xf3 PF: > { %p1209_p4 = scmp.ne.s32.totalorder %s1405_s25, 0 }
  0xf5   : > { %510 = sbr.rel (%p1209_p4) target bundleno = 301 (0x12d), region = 52 }
  0xfa   : > { %v512_v53 = vadd.f32 %v1632_v23, %v1624_v19  ;;  %v533_v54 = vadd.f32 %v1634_v24, %v1626_v20  ;;  %v567_v61 = vmul.f32 %v1624_v19, %v1624_v19  ;;  %v568_v62 = vmul.f32 %v1626_v20, %v1626_v20 }
  0xfb   : > { %v569_v63 = vmul.f32 %v1632_v23, %v1632_v23  ;;  %v570_v0 = vmul.f32 %v1634_v24, %v1634_v24  ;;  %v571_v3 = vmul.f32 %v1640_v27, %v1640_v27  ;;  %v572_v4 = vmul.f32 %v1642_v28, %v1642_v28 }
  0xfc   : > { %v513_v55 = vadd.f32 %v512_v53, %v1640_v27  ;;  %v534_v56 = vadd.f32 %v533_v54, %v1642_v28  ;;  %v573_v7 = vmul.f32 %v1648_v31, %v1648_v31  ;;  %v574_v8 = vmul.f32 %v1650_v32, %v1650_v32 }
  0xfd   : > { %v599_v9 = vadd.f32 %v569_v63, %v567_v61  ;;  %v620_v10 = vadd.f32 %v570_v0, %v568_v62  ;;  %v575_v13 = vmul.f32 %v1656_v35, %v1656_v35  ;;  %v576_v14 = vmul.f32 %v1658_v36, %v1658_v36 }
  0xfe   : > { %v514_v57 = vadd.f32 %v513_v55, %v1648_v31  ;;  %v535_v58 = vadd.f32 %v534_v56, %v1650_v32  ;;  %v577_v51 = vmul.f32 %v1664_v39, %v1664_v39  ;;  %v578_v52 = vmul.f32 %v1666_v40, %v1666_v40 }
  0xff   : > { %v600_v15 = vadd.f32 %v599_v9, %v571_v3  ;;  %v621_v16 = vadd.f32 %v620_v10, %v572_v4  ;;  %v581_v63 = vmul.f32 %v1680_v47, %v1680_v47  ;;  %v582_v0 = vmul.f32 %v1682_v48, %v1682_v48 }
 0x100   : > { %v515_v59 = vadd.f32 %v514_v57, %v1656_v35  ;;  %v536_v60 = vadd.f32 %v535_v58, %v1658_v36  ;;  %v579_v57 = vmul.f32 %v1672_v43, %v1672_v43  ;;  %v580_v58 = vmul.f32 %v1674_v44, %v1674_v44 }
 0x101   : > { %v601_v53 = vadd.f32 %v600_v15, %v573_v7  ;;  %v622_v54 = vadd.f32 %v621_v16, %v574_v8  ;;  %vm557_vm3 = vcmask 1040384  }
 0x102   : > { %v516_v1 = vadd.f32 %v515_v59, %v1664_v39  ;;  %v537_v2 = vadd.f32 %v536_v60, %v1666_v40 }
 0x103   : > { %v602_v59 = vadd.f32 %v601_v53, %v575_v13  ;;  %v623_v60 = vadd.f32 %v622_v54, %v576_v14 }
 0x104   : > { %v517_v5 = vadd.f32 %v516_v1, %v1672_v43  ;;  %v538_v6 = vadd.f32 %v537_v2, %v1674_v44 }
 0x105   : > { %v603_v1 = vadd.f32 %v602_v59, %v577_v51  ;;  %v624_v2 = vadd.f32 %v623_v60, %v578_v52 }
 0x106   : > { %v518_v11 = vadd.f32 %v517_v5, %v1680_v47  ;;  %v539_v12 = vadd.f32 %v538_v6, %v1682_v48  ;;  %v583_v5 = vmul.f32 %v1628_v21, %v1628_v21  ;;  %v584_v6 = vmul.f32 %v1630_v22, %v1630_v22 }
 0x107   : > { %v604_v7 = vadd.f32 %v603_v1, %v579_v57  ;;  %v625_v8 = vadd.f32 %v624_v2, %v580_v58 }
 0x108   : > { %v519_v17 = vadd.f32 %v518_v11, %v1628_v21  ;;  %v540_v18 = vadd.f32 %v539_v12, %v1630_v22  ;;  %v585_v11 = vmul.f32 %v1636_v25, %v1636_v25  ;;  %v586_v12 = vmul.f32 %v1638_v26, %v1638_v26 }
 0x109   : > { %v605_v13 = vadd.f32 %v604_v7, %v581_v63  ;;  %v626_v14 = vadd.f32 %v625_v8, %v582_v0 }
 0x10a   : > { %v520_v55 = vadd.f32 %v519_v17, %v1636_v25  ;;  %v541_v56 = vadd.f32 %v540_v18, %v1638_v26  ;;  %v587_v17 = vmul.f32 %v1644_v29, %v1644_v29  ;;  %v588_v18 = vmul.f32 %v1646_v30, %v1646_v30 }
 0x10b   : > { %v606_v51 = vadd.f32 %v605_v13, %v583_v5  ;;  %v627_v52 = vadd.f32 %v626_v14, %v584_v6 }
 0x10c   : > { %v521_v61 = vadd.f32 %v520_v55, %v1644_v29  ;;  %v542_v62 = vadd.f32 %v541_v56, %v1646_v30  ;;  %v589_v55 = vmul.f32 %v1652_v33, %v1652_v33  ;;  %v590_v56 = vmul.f32 %v1654_v34, %v1654_v34 }
 0x10d   : > { %v607_v57 = vadd.f32 %v606_v51, %v585_v11  ;;  %v628_v58 = vadd.f32 %v627_v52, %v586_v12 }
 0x10e   : > { %v522_v3 = vadd.f32 %v521_v61, %v1652_v33  ;;  %v543_v4 = vadd.f32 %v542_v62, %v1654_v34  ;;  %v591_v61 = vmul.f32 %v1660_v37, %v1660_v37  ;;  %v592_v62 = vmul.f32 %v1662_v38, %v1662_v38 }
 0x10f   : > { %v608_v63 = vadd.f32 %v607_v57, %v587_v17  ;;  %v629_v0 = vadd.f32 %v628_v58, %v588_v18 }
 0x110   : > { %v523_v9 = vadd.f32 %v522_v3, %v1660_v37  ;;  %v544_v10 = vadd.f32 %v543_v4, %v1662_v38  ;;  %v593_v3 = vmul.f32 %v1668_v41, %v1668_v41  ;;  %v594_v4 = vmul.f32 %v1670_v42, %v1670_v42 }
 0x111   : > { %v609_v5 = vadd.f32 %v608_v63, %v589_v55  ;;  %v630_v6 = vadd.f32 %v629_v0, %v590_v56  ;;  %v511_v0 = vld [vmem:[#allocation2] sm:$0x3] }
 0x112   : > { %v524_v15 = vadd.f32 %v523_v9, %v1668_v41  ;;  %v545_v16 = vadd.f32 %v544_v10, %v1670_v42  ;;  %v595_v9 = vmul.f32 %v1676_v45, %v1676_v45  ;;  %v596_v10 = vmul.f32 %v1678_v46, %v1678_v46 }
 0x113   : > { %v610_v11 = vadd.f32 %v609_v5, %v591_v61  ;;  %v631_v12 = vadd.f32 %v630_v6, %v592_v62  ;;  %v561_v61 = vlaneseq }
 0x114   : > { %v525_v53 = vadd.f32 %v524_v15, %v1676_v45  ;;  %v546_v54 = vadd.f32 %v545_v16, %v1678_v46  ;;  %v597_v15 = vmul.f32 %v1684_v49, %v1684_v49  ;;  %v598_v16 = vmul.f32 %v1686_v50, %v1686_v50 }
 0x115   : > { %v611_v17 = vadd.f32 %v610_v11, %v593_v3  ;;  %v632_v18 = vadd.f32 %v631_v12, %v594_v4  ;;  %vm563_vm4 = vcmp.lt.s32.totalorder %v561_v61, 256 }
 0x116   : > { %v526_v59 = vadd.f32 %v525_v53, %v1684_v49  ;;  %v547_v60 = vadd.f32 %v546_v54, %v1686_v50 }
 0x117   : > { %v612_v53 = vadd.f32 %v611_v17, %v595_v9  ;;  %v633_v54 = vadd.f32 %v632_v18, %v596_v10 }
 0x118   : > { %v527_v1 = vrot.slane %v526_v59, 4  ;;  %v548_v2 = vrot.slane %v547_v60, 4 }
 0x119   : > { %v613_v57 = vadd.f32 %v612_v53, %v597_v15  ;;  %v634_v58 = vadd.f32 %v633_v54, %v598_v16 }
 0x11a   : > { %v528_v7 = vadd.f32 %v527_v1, %v526_v59  ;;  %v549_v8 = vadd.f32 %v548_v2, %v547_v60 }
 0x11b   : > { %v614_v62 = vrot.slane %v613_v57, 4  ;;  %v635_v63 = vrot.slane %v634_v58, 4 }
 0x11c   : > { %v529_v13 = vrot.slane %v528_v7, 2  ;;  %v550_v14 = vrot.slane %v549_v8, 2 }
 0x11d   : > { %v615_v2 = vadd.f32 %v614_v62, %v613_v57  ;;  %v636_v5 = vadd.f32 %v635_v63, %v634_v58 }
 0x11e   : > { %v530_v51 = vadd.f32 %v529_v13, %v528_v7  ;;  %v551_v52 = vadd.f32 %v550_v14, %v549_v8  ;;  %v566_v14 = vld [vmem:[#allocation3] sm:$0x3] }
 0x11f   : > { %v616_v6 = vrot.slane %v615_v2, 2  ;;  %v637_v7 = vrot.slane %v636_v5, 2 }
 0x120   : > { %v531_v55 = vrot.slane %v530_v51, 1  ;;  %v552_v56 = vrot.slane %v551_v52, 1 }
 0x121   : > { %v617_v8 = vadd.f32 %v616_v6, %v615_v2  ;;  %v638_v9 = vadd.f32 %v637_v7, %v636_v5 }
 0x122   : > { %v532_v59 = vadd.f32 %v531_v55, %v530_v51  ;;  %v553_v60 = vadd.f32 %v552_v56, %v551_v52 }
 0x123   : > { %v618_v10 = vrot.slane %v617_v8, 1  ;;  %v639_v11 = vrot.slane %v638_v9, 1 }
 0x124   : > { %v556_v1 = vrot.slane %v553_v60, 7 }
 0x125   : > { %v619_v12 = vadd.f32 %v618_v10, %v617_v8  ;;  %v640_v13 = vadd.f32 %v639_v11, %v638_v9 }
 0x126   : > { %v558_v3 = vsel %vm557_vm3, %v532_v59, %v556_v1 }
 0x127   : > { %v560_v4 = vadd.f32 %v558_v3, %v511_v0  ;;  %v643_v15 = vrot.slane %v640_v13, 7 }
 0x129   : > { %565 = vst.msk [vmem:[#allocation2] sm:$0x3] %vm563_vm4, %v560_v4  ;;  %v644_v16 = vsel %vm557_vm3, %v619_v12, %v643_v15 }
 0x12a   : > { %v646_v17 = vadd.f32 %v644_v16, %v566_v14 }
 0x12c   : > { %647 = vst.msk [vmem:[#allocation3] sm:$0x3] %vm563_vm4, %v646_v17 }
 0x12d PF: > { %p648_p6 = scmp.eq.s32.totalorder %s1401_s24, 1 }
 0x12f   : > { %p649_p8 = pnand %p648_p6, %p496_p1 }
 0x130   : > { %s2534_s2 = sld [smem:[#allocation45_spill]] (!%p649_p8) }
 0x131   : > { %652 = sbr.rel (%p649_p8) target bundleno = 544 (0x220), region = 56  ;;  %s2535_s3 = sld [smem:[#allocation46_spill]] (!%p649_p8) }
 0x132   : > { %s2536_s4 = sld [smem:[#allocation47_spill]] (!%p649_p8) }
 0x136   : > { %v1798_v18 = vld [vmem:[%s2453_s5 + $0xf0] sm:$0xff]  ;;  %v1808_v52 = vld [vmem:[%s2453_s5 + $0xf8] sm:$0xff]  ;;  %v1820_v54 = vld [vmem:[%s2453_s5 + $0xe0] sm:$0xff]  ;;  %vm927_vm6 = vcmask 1040384  }
 0x137   : > { %v1803_v51 = vld [vmem:[%s2453_s5 + $0x1f0] sm:$0xff]  ;;  %732 = vmatpush.msra.mxu0 %v1798_v18  ;;  %v1815_v53 = vld [vmem:[%s2453_s5 + $0x1f8] sm:$0xff]  ;;  %v1825_v55 = vld [vmem:[%s2453_s5 + $0x1e0] sm:$0xff]  ;;  %772 = vmatpush.msra.mxu2 %v1808_v52 }
 0x138   : > { %752 = vmatpush.msra.mxu1 %v1803_v51  ;;  %792 = vmatpush.msra.mxu3 %v1815_v53  ;;  %v1832_v56 = vld [vmem:[%s2453_s5 + $0xe8] sm:$0xff]  ;;  %v1842_v58 = vld [vmem:[%s2453_s5 + $0xd0] sm:$0xff]  ;;  %v1854_v60 = vld [vmem:[%s2453_s5 + $0xd8] sm:$0xff] }
 0x139   : > { %v1837_v57 = vld [vmem:[%s2453_s5 + $0x1e8] sm:$0xff]  ;;  %733 = vmatpush.msra.mxu0 %v1820_v54  ;;  %v1849_v59 = vld [vmem:[%s2453_s5 + $0x1d0] sm:$0xff]  ;;  %v1859_v61 = vld [vmem:[%s2453_s5 + $0x1d8] sm:$0xff]  ;;  %773 = vmatpush.msra.mxu2 %v1832_v56 }
 0x13a   : > { %753 = vmatpush.msra.mxu1 %v1825_v55  ;;  %793 = vmatpush.msra.mxu3 %v1837_v57  ;;  %v1866_v62 = vld [vmem:[%s2453_s5 + $0xc0] sm:$0xff]  ;;  %v1878_v0 = vld [vmem:[%s2453_s5 + $0xc8] sm:$0xff]  ;;  %v1890_v2 = vld [vmem:[%s2453_s5 + $0xb0] sm:$0xff] }
 0x13b   : > { %v1871_v63 = vld [vmem:[%s2453_s5 + $0x1c0] sm:$0xff]  ;;  %734 = vmatpush.msra.mxu0 %v1842_v58  ;;  %v1883_v1 = vld [vmem:[%s2453_s5 + $0x1c8] sm:$0xff]  ;;  %774 = vmatpush.msra.mxu2 %v1854_v60  ;;  %v1895_v5 = vld [vmem:[%s2453_s5 + $0x1b0] sm:$0xff] }
 0x13c   : > { %754 = vmatpush.msra.mxu1 %v1849_v59  ;;  %794 = vmatpush.msra.mxu3 %v1859_v61  ;;  %v1902_v3 = vld [vmem:[%s2453_s5 + $0xb8] sm:$0xff]  ;;  %v1914_v6 = vld [vmem:[%s2453_s5 + $0xa0] sm:$0xff]  ;;  %v1926_v8 = vld [vmem:[%s2453_s5 + $0xa8] sm:$0xff] }
 0x13d   : > { %735 = vmatpush.msra.mxu0 %v1866_v62  ;;  %v1907_v4 = vld [vmem:[%s2453_s5 + $0x1b8] sm:$0xff]  ;;  %775 = vmatpush.msra.mxu2 %v1878_v0  ;;  %v1919_v7 = vld [vmem:[%s2453_s5 + $0x1a0] sm:$0xff]  ;;  %v1931_v9 = vld [vmem:[%s2453_s5 + $0x1a8] sm:$0xff] }
 0x13e   : > { %755 = vmatpush.msra.mxu1 %v1871_v63  ;;  %795 = vmatpush.msra.mxu3 %v1883_v1  ;;  %v1938_v10 = vld [vmem:[%s2453_s5 + $0x90] sm:$0xff]  ;;  %v1950_v12 = vld [vmem:[%s2453_s5 + $0x98] sm:$0xff]  ;;  %v1962_v14 = vld [vmem:[%s2453_s5 + $0x80] sm:$0xff] }
 0x13f   : > { %736 = vmatpush.msra.mxu0 %v1890_v2  ;;  %776 = vmatpush.msra.mxu2 %v1902_v3  ;;  %v1943_v11 = vld [vmem:[%s2453_s5 + $0x190] sm:$0xff]  ;;  %v1955_v13 = vld [vmem:[%s2453_s5 + $0x198] sm:$0xff]  ;;  %v1967_v15 = vld [vmem:[%s2453_s5 + $0x180] sm:$0xff] }
 0x140   : > { %756 = vmatpush.msra.mxu1 %v1895_v5  ;;  %796 = vmatpush.msra.mxu3 %v1907_v4  ;;  %v1974_v16 = vld [vmem:[%s2453_s5 + $0x88] sm:$0xff]  ;;  %v1986_v50 = vld [vmem:[%s2453_s5 + $0x70] sm:$0xff]  ;;  %v1998_v46 = vld [vmem:[%s2453_s5 + $0x78] sm:$0xff] }
 0x141   : > { %737 = vmatpush.msra.mxu0 %v1914_v6  ;;  %777 = vmatpush.msra.mxu2 %v1926_v8  ;;  %v1979_v17 = vld [vmem:[%s2453_s5 + $0x188] sm:$0xff]  ;;  %v1991_v49 = vld [vmem:[%s2453_s5 + $0x170] sm:$0xff]  ;;  %v2003_v45 = vld [vmem:[%s2453_s5 + $0x178] sm:$0xff] }
 0x142   : > { %757 = vmatpush.msra.mxu1 %v1919_v7  ;;  %797 = vmatpush.msra.mxu3 %v1931_v9  ;;  %v2010_v42 = vld [vmem:[%s2453_s5 + $0x60] sm:$0xff]  ;;  %v2022_v38 = vld [vmem:[%s2453_s5 + $0x68] sm:$0xff]  ;;  %v2034_v34 = vld [vmem:[%s2453_s5 + $0x50] sm:$0xff] }
 0x143   : > { %738 = vmatpush.msra.mxu0 %v1938_v10  ;;  %778 = vmatpush.msra.mxu2 %v1950_v12  ;;  %v2015_v41 = vld [vmem:[%s2453_s5 + $0x160] sm:$0xff]  ;;  %v2027_v37 = vld [vmem:[%s2453_s5 + $0x168] sm:$0xff]  ;;  %v2039_v33 = vld [vmem:[%s2453_s5 + $0x150] sm:$0xff] }
 0x144   : > { %758 = vmatpush.msra.mxu1 %v1943_v11  ;;  %798 = vmatpush.msra.mxu3 %v1955_v13  ;;  %v2046_v30 = vld [vmem:[%s2453_s5 + $0x58] sm:$0xff]  ;;  %v2058_v26 = vld [vmem:[%s2453_s5 + $0x40] sm:$0xff]  ;;  %v2070_v22 = vld [vmem:[%s2453_s5 + $0x48] sm:$0xff] }
 0x145   : > { %739 = vmatpush.msra.mxu0 %v1962_v14  ;;  %779 = vmatpush.msra.mxu2 %v1974_v16  ;;  %v2051_v29 = vld [vmem:[%s2453_s5 + $0x158] sm:$0xff]  ;;  %v2063_v25 = vld [vmem:[%s2453_s5 + $0x140] sm:$0xff]  ;;  %v2075_v21 = vld [vmem:[%s2453_s5 + $0x148] sm:$0xff] }
 0x146   : > { %759 = vmatpush.msra.mxu1 %v1967_v15  ;;  %799 = vmatpush.msra.mxu3 %v1979_v17  ;;  %v2082_v48 = vld [vmem:[%s2453_s5 + $0x30] sm:$0xff]  ;;  %v2094_v44 = vld [vmem:[%s2453_s5 + $0x38] sm:$0xff]  ;;  %v2106_v40 = vld [vmem:[%s2453_s5 + $0x20] sm:$0xff] }
 0x147   : > { %740 = vmatpush.msra.mxu0 %v1986_v50  ;;  %780 = vmatpush.msra.mxu2 %v1998_v46  ;;  %v2087_v47 = vld [vmem:[%s2453_s5 + $0x130] sm:$0xff]  ;;  %v2099_v43 = vld [vmem:[%s2453_s5 + $0x138] sm:$0xff]  ;;  %v2111_v39 = vld [vmem:[%s2453_s5 + $0x120] sm:$0xff] }
 0x148   : > { %760 = vmatpush.msra.mxu1 %v1991_v49  ;;  %800 = vmatpush.msra.mxu3 %v2003_v45  ;;  %v2118_v36 = vld [vmem:[%s2453_s5 + $0x28] sm:$0xff]  ;;  %v2130_v32 = vld [vmem:[%s2453_s5 + $0x10] sm:$0xff]  ;;  %v2142_v28 = vld [vmem:[%s2453_s5 + $0x18] sm:$0xff] }
 0x149   : > { %741 = vmatpush.msra.mxu0 %v2010_v42  ;;  %781 = vmatpush.msra.mxu2 %v2022_v38  ;;  %v2123_v35 = vld [vmem:[%s2453_s5 + $0x128] sm:$0xff]  ;;  %v2135_v31 = vld [vmem:[%s2453_s5 + $0x110] sm:$0xff]  ;;  %v2147_v27 = vld [vmem:[%s2453_s5 + $0x118] sm:$0xff] }
 0x14a   : > { %761 = vmatpush.msra.mxu1 %v2015_v41  ;;  %801 = vmatpush.msra.mxu3 %v2027_v37  ;;  %v2154_v24 = vld [vmem:[%s2453_s5] sm:$0xff]  ;;  %v2166_v20 = vld [vmem:[%s2453_s5 + $0x8] sm:$0xff] }
 0x14b   : > { %742 = vmatpush.msra.mxu0 %v2034_v34  ;;  %782 = vmatpush.msra.mxu2 %v2046_v30  ;;  %v2159_v23 = vld [vmem:[%s2453_s5 + $0x100] sm:$0xff]  ;;  %v2171_v19 = vld [vmem:[%s2453_s5 + $0x108] sm:$0xff] }
 0x14c   : > { %762 = vmatpush.msra.mxu1 %v2039_v33  ;;  %802 = vmatpush.msra.mxu3 %v2051_v29 }
 0x14d   : > { %743 = vmatpush.msra.mxu0 %v2058_v26  ;;  %783 = vmatpush.msra.mxu2 %v2070_v22 }
 0x14e   : > { %763 = vmatpush.msra.mxu1 %v2063_v25  ;;  %803 = vmatpush.msra.mxu3 %v2075_v21 }
 0x14f   : > { %744 = vmatpush.msra.mxu0 %v2082_v48  ;;  %784 = vmatpush.msra.mxu2 %v2094_v44 }
 0x150   : > { %764 = vmatpush.msra.mxu1 %v2087_v47  ;;  %804 = vmatpush.msra.mxu3 %v2099_v43 }
 0x151   : > { %745 = vmatpush.msra.mxu0 %v2106_v40  ;;  %785 = vmatpush.msra.mxu2 %v2118_v36 }
 0x152   : > { %765 = vmatpush.msra.mxu1 %v2111_v39  ;;  %805 = vmatpush.msra.mxu3 %v2123_v35 }
 0x153   : > { %746 = vmatpush.msra.mxu0 %v2130_v32  ;;  %786 = vmatpush.msra.mxu2 %v2142_v28 }
 0x154   : > { %766 = vmatpush.msra.mxu1 %v2135_v31  ;;  %806 = vmatpush.msra.mxu3 %v2147_v27 }
 0x155   : > { %747 = vmatpush.msra.mxu0 %v2154_v24  ;;  %787 = vmatpush.msra.mxu2 %v2166_v20 }
 0x156   : > { %767 = vmatpush.msra.mxu1 %v2159_v23  ;;  %807 = vmatpush.msra.mxu3 %v2171_v19 }
 0x157   : > { %817 = vmatpush.msrb.mxu0 %v1798_v18  ;;  %857 = vmatpush.msrb.mxu2 %v1808_v52  ;;  %v2202_v18 = vld [vmem:[%s2534_s2] sm:$0x3]  ;;  %v654_v52 = vld [vmem:[#allocation2] sm:$0x3] }
 0x158   : > { %837 = vmatpush.msrb.mxu1 %v1803_v51  ;;  %877 = vmatpush.msrb.mxu3 %v1815_v53  ;;  %v656_v51 = vmul.f32 256.0, %v2202_v18  ;;  %v658_v53 = vmul.f32 2.0, %v2202_v18 }
 0x159   : > { %818 = vmatpush.msrb.mxu0 %v1820_v54  ;;  %858 = vmatpush.msrb.mxu2 %v1832_v56  ;;  %v655_v56 = vld [vmem:[#allocation3] sm:$0x3] }
 0x15a   : > { %838 = vmatpush.msrb.mxu1 %v1825_v55  ;;  %878 = vmatpush.msrb.mxu3 %v1837_v57  ;;  %v657_v54 = vadd.f32 %v656_v51, %v654_v52  ;;  %v659_v55 = vmul.f32 %v658_v53, %v654_v52 }
 0x15b   : > { %819 = vmatpush.msrb.mxu0 %v1842_v58  ;;  %859 = vmatpush.msrb.mxu2 %v1854_v60 }
 0x15c   : > { %839 = vmatpush.msrb.mxu1 %v1849_v59  ;;  %879 = vmatpush.msrb.mxu3 %v1859_v61 }
 0x15d   : > { %820 = vmatpush.msrb.mxu0 %v1866_v62  ;;  %860 = vmatpush.msrb.mxu2 %v1878_v0 }
 0x15e   : > { %840 = vmatpush.msrb.mxu1 %v1871_v63  ;;  %880 = vmatpush.msrb.mxu3 %v1883_v1  ;;  %v931_v63 = vlaneseq }
 0x15f   : > { %821 = vmatpush.msrb.mxu0 %v1890_v2  ;;  %861 = vmatpush.msrb.mxu2 %v1902_v3  ;;  %v901_v2 = vld [vmem:[%s2535_s3] sm:$0x3] }
 0x160   : > { %841 = vmatpush.msrb.mxu1 %v1895_v5  ;;  %881 = vmatpush.msrb.mxu3 %v1907_v4  ;;  %vm933_vm12 = vcmp.lt.s32.totalorder %v931_v63, 256 }
 0x161   : > { %822 = vmatpush.msrb.mxu0 %v1914_v6  ;;  %862 = vmatpush.msrb.mxu2 %v1926_v8  ;;  %v936_v8 = vld [vmem:[%s2536_s4] sm:$0x3] }
 0x162   : > { %842 = vmatpush.msrb.mxu1 %v1919_v7  ;;  %882 = vmatpush.msrb.mxu3 %v1931_v9 }
 0x163   : > { %823 = vmatpush.msrb.mxu0 %v1938_v10  ;;  %863 = vmatpush.msrb.mxu2 %v1950_v12 }
 0x164   : > { %843 = vmatpush.msrb.mxu1 %v1943_v11  ;;  %883 = vmatpush.msrb.mxu3 %v1955_v13 }
 0x165   : > { %824 = vmatpush.msrb.mxu0 %v1962_v14  ;;  %864 = vmatpush.msrb.mxu2 %v1974_v16 }
 0x166   : > { %844 = vmatpush.msrb.mxu1 %v1967_v15  ;;  %884 = vmatpush.msrb.mxu3 %v1979_v17 }
 0x167   : > { %825 = vmatpush.msrb.mxu0 %v1986_v50  ;;  %865 = vmatpush.msrb.mxu2 %v1998_v46  ;;  %v729_v50 = vperm.slane %v657_v54, 1 }
 0x168   : > { %845 = vmatpush.msrb.mxu1 %v1991_v49  ;;  %885 = vmatpush.msrb.mxu3 %v2003_v45  ;;  %v728_v49 = vperm.slane %v657_v54, 0 }
 0x169   : > { %826 = vmatpush.msrb.mxu0 %v2010_v42  ;;  %866 = vmatpush.msrb.mxu2 %v2022_v38  ;;  %v661_v38 = vmul.f32 %v656_v51, %v2202_v18 }
 0x16a   : > { %846 = vmatpush.msrb.mxu1 %v2015_v41  ;;  %886 = vmatpush.msrb.mxu3 %v2027_v37  ;;  %v660_v41 = vadd.f32 %v659_v55, %v655_v56 }
 0x16b   : > { %827 = vmatpush.msrb.mxu0 %v2034_v34  ;;  %867 = vmatpush.msrb.mxu2 %v2046_v30 }
 0x16c   : > { %847 = vmatpush.msrb.mxu1 %v2039_v33  ;;  %887 = vmatpush.msrb.mxu3 %v2051_v29  ;;  %v662_v29 = vadd.f32 %v661_v38, %v660_v41 }
 0x16d   : > { %828 = vmatpush.msrb.mxu0 %v2058_v26  ;;  %868 = vmatpush.msrb.mxu2 %v2070_v22 }
 0x16e   : > { %848 = vmatpush.msrb.mxu1 %v2063_v25  ;;  %888 = vmatpush.msrb.mxu3 %v2075_v21  ;;  %v813_v21 = vperm.slane %v662_v29, 0  ;;  %v814_v22 = vperm.slane %v662_v29, 1 }
 0x16f   : > { %748 = vmatmul.f32.vlgmr.msra.gmra.mxu0 %v728_v49  ;;  %768 = vmatmul.f32.vlgmr.msra.gmra.mxu1 %v729_v50 }
 0x170   : > { %788 = vmatmul.f32.vlgmr.msra.gmra.mxu2 %v728_v49  ;;  %808 = vmatmul.f32.vlgmr.msra.gmra.mxu3 %v729_v50 }
 0x171   : > { %829 = vmatpush.msrb.mxu0 %v2082_v48  ;;  %849 = vmatpush.msrb.mxu1 %v2087_v47 }
 0x172   : > { %869 = vmatpush.msrb.mxu2 %v2094_v44  ;;  %889 = vmatpush.msrb.mxu3 %v2099_v43 }
 0x173   : > { %830 = vmatpush.msrb.mxu0 %v2106_v40  ;;  %850 = vmatpush.msrb.mxu1 %v2111_v39 }
 0x174   : > { %870 = vmatpush.msrb.mxu2 %v2118_v36  ;;  %890 = vmatpush.msrb.mxu3 %v2123_v35 }
 0x175   : > { %831 = vmatpush.msrb.mxu0 %v2130_v32  ;;  %851 = vmatpush.msrb.mxu1 %v2135_v31 }
 0x176   : > { %871 = vmatpush.msrb.mxu2 %v2142_v28  ;;  %891 = vmatpush.msrb.mxu3 %v2147_v27 }
 0x177   : > { %832 = vmatpush.msrb.mxu0 %v2154_v24  ;;  %852 = vmatpush.msrb.mxu1 %v2159_v23 }
 0x178   : > { %872 = vmatpush.msrb.mxu2 %v2166_v20  ;;  %892 = vmatpush.msrb.mxu3 %v2171_v19 }
 0x179   : > { %833 = vmatmul.f32.vlgmr.msrb.gmra.mxu0 %v813_v21  ;;  %853 = vmatmul.f32.vlgmr.msrb.gmra.mxu1 %v814_v22 }
 0x17a   : > { %873 = vmatmul.f32.vlgmr.msrb.gmra.mxu2 %v813_v21  ;;  %893 = vmatmul.f32.vlgmr.msrb.gmra.mxu3 %v814_v22 }
 0x1ec   : > { %v749_v25 = vpop.f32.mrf.mxu0  ;;  %v769_v26 = vpop.f32.mrf.mxu1 }
 0x1ed   : > { %v770_v30 = vadd.f32 %v769_v26, %v749_v25 }
 0x1ef   : > { %v897_v28 = vmul.f32 %v770_v30, %v770_v30 }
 0x1f3   : > { %v789_v31 = vpop.f32.mrf.mxu2  ;;  %v809_v32 = vpop.f32.mrf.mxu3 }
 0x1f4   : > { %v810_v35 = vadd.f32 %v809_v32, %v789_v31 }
 0x1f6   : > { %v834_v33 = vpop.f32.mrf.mxu0  ;;  %v854_v27 = vpop.f32.mrf.mxu1  ;;  %v898_v19 = vmul.f32 %v810_v35, %v810_v35  ;;  %v939_v60 = vrot.slane %v810_v35, 7 }
 0x1f7   : > { %v855_v34 = vadd.f32 %v854_v27, %v834_v33 }
 0x1f8   : > { %v940_v1 = vsel %vm927_vm6, %v770_v30, %v939_v60 }
 0x1f9   : > { %v899_v24 = vsub.f32 %v855_v34, %v897_v28  ;;  %v942_v6 = vsub.f32 %v2202_v18, %v940_v1 }
 0x1fb   : > { %v902_v23 = vadd.f32 1e-05, %v899_v24 }
 0x1fd   : > { %1311 = vrsqrt.f32 %v902_v23  ;;  %v874_v20 = vpop.f32.mrf.mxu2  ;;  %v894_v36 = vpop.f32.mrf.mxu3  ;;  %vm910_vm10 = vweird.f32 %v902_v23 }
 0x1fe   : > { %v895_v37 = vadd.f32 %v894_v36, %v874_v20 }
 0x200   : > { %v900_v39 = vsub.f32 %v895_v37, %v898_v19 }
 0x202   : > { %v903_v40 = vadd.f32 1e-05, %v900_v39 }
 0x203   : > { %v1312_v42 = vpop.eup %1311 }
 0x204   : > { %v905_v43 = vmul.f32 %v1312_v42, %v902_v23  ;;  %1313 = vrsqrt.f32 %v903_v40  ;;  %vm911_vm7 = vweird.f32 %v1312_v42  ;;  %vm920_vm8 = vweird.f32 %v903_v40 }
 0x205   : > { %vm912_vm11 = vmor %vm910_vm10, %vm911_vm7 }
 0x206   : > { %v906_v44 = vmul.f32 %v1312_v42, %v905_v43 }
 0x208   : > { %v907_v46 = vmul.f32 0.5, %v906_v44 }
 0x20a   : > { %v1314_v45 = vpop.eup %1313  ;;  %v908_v57 = vsub.f32 1.5, %v907_v46 }
 0x20b   : > { %v915_v47 = vmul.f32 %v1314_v45, %v903_v40  ;;  %vm921_vm5 = vweird.f32 %v1314_v45 }
 0x20c   : > { %v909_v61 = vmul.f32 %v1312_v42, %v908_v57  ;;  %vm922_vm9 = vmor %vm920_vm8, %vm921_vm5 }
 0x20d   : > { %v916_v48 = vmul.f32 %v1314_v45, %v915_v47 }
 0x20e   : > { %v913_v3 = vsel %vm912_vm11, %v1312_v42, %v909_v61 }
 0x20f   : > { %v917_v58 = vmul.f32 0.5, %v916_v48 }
 0x211   : > { %v918_v59 = vsub.f32 1.5, %v917_v58 }
 0x213   : > { %v919_v62 = vmul.f32 %v1314_v45, %v918_v59 }
 0x215   : > { %v923_v0 = vsel %vm922_vm9, %v1314_v45, %v919_v62 }
 0x216   : > { %v926_v5 = vrot.slane %v923_v0, 7 }
 0x218   : > { %v928_v4 = vsel %vm927_vm6, %v913_v3, %v926_v5 }
 0x219   : > { %v930_v7 = vmul.f32 %v928_v4, %v901_v2 }
 0x21b   : > { %935 = vst.msk [vmem:[#allocation4] sm:$0x3] %vm933_vm12, %v930_v7  ;;  %v943_v9 = vmul.f32 %v942_v6, %v930_v7 }
 0x21d   : > { %v944_v10 = vadd.f32 %v943_v9, %v936_v8 }
 0x21f   : > { %945 = vst.msk [vmem:[#allocation5] sm:$0x3] %vm933_vm12, %v944_v10 }
 0x220 PF: > { %p1210_p9 = scmp.ne.s32.totalorder %s1405_s25, 1 }
 0x222   : > { %949 = sbr.rel (%p1210_p9) target bundleno = 590 (0x24e), region = 60 }
 0x227   : > { %v950_v11 = vld [vmem:[#allocation4] sm:$0x3]  ;;  %v988_v12 = vld [vmem:[#allocation5] sm:$0x3]  ;;  %v2537_v17 = vld [vmem:[#allocation11_spill] sm:$0xff] }
 0x228   : > { %v2259_v13 = vperm.slane %v950_v11, 0  ;;  %v2261_v14 = vperm.slane %v988_v12, 0  ;;  %v2263_v15 = vperm.slane %v950_v11, 1  ;;  %v2265_v16 = vperm.slane %v988_v12, 1  ;;  %v2538_v51 = vld [vmem:[#allocation12_spill] sm:$0xff]  ;;  %v2539_v53 = vld [vmem:[#allocation15_spill] sm:$0xff] }
 0x229   : > { %v2540_v55 = vld [vmem:[#allocation16_spill] sm:$0xff]  ;;  %v2541_v49 = vld [vmem:[#allocation19_spill] sm:$0xff]  ;;  %v2553_v62 = vld [vmem:[#allocation13_spill] sm:$0xff] }
 0x22a   : > { %v956_v18 = vmul.f32 %v2259_v13, %v2537_v17  ;;  %v957_v52 = vmul.f32 %v2263_v15, %v2538_v51  ;;  %v958_v54 = vmul.f32 %v2259_v13, %v2539_v53  ;;  %v959_v56 = vmul.f32 %v2263_v15, %v2540_v55  ;;  %v2542_v41 = vld [vmem:[#allocation20_spill] sm:$0xff]  ;;  %v2543_v25 = vld [vmem:[#allocation23_spill] sm:$0xff]  ;;  %v2554_v1 = vld [vmem:[#allocation14_spill] sm:$0xff] }
 0x22b   : > { %v960_v50 = vmul.f32 %v2259_v13, %v2541_v49  ;;  %v961_v38 = vmul.f32 %v2263_v15, %v2542_v41  ;;  %v962_v26 = vmul.f32 %v2259_v13, %v2543_v25  ;;  %v2544_v31 = vld [vmem:[#allocation24_spill] sm:$0xff]  ;;  %v2545_v33 = vld [vmem:[#allocation27_spill] sm:$0xff]  ;;  %v972_v63 = vmul.f32 %v2259_v13, %v2553_v62  ;;  %v2555_v3 = vld [vmem:[#allocation17_spill] sm:$0xff] }
 0x22c   : > { %v994_v29 = vadd.f32 %v2261_v14, %v956_v18  ;;  %v995_v21 = vadd.f32 %v2265_v16, %v957_v52  ;;  %v996_v22 = vadd.f32 %v2261_v14, %v958_v54  ;;  %v997_v30 = vadd.f32 %v2265_v16, %v959_v56  ;;  %v2546_v24 = vld [vmem:[#allocation28_spill] sm:$0xff]  ;;  %v2547_v20 = vld [vmem:[#allocation31_spill] sm:$0xff]  ;;  %v2556_v7 = vld [vmem:[#allocation18_spill] sm:$0xff] }
 0x22d   : > { %v963_v32 = vmul.f32 %v2263_v15, %v2544_v31  ;;  %v998_v28 = vadd.f32 %v2261_v14, %v960_v50  ;;  %v964_v27 = vmul.f32 %v2259_v13, %v2545_v33  ;;  %v999_v34 = vadd.f32 %v2265_v16, %v961_v38  ;;  %v2548_v37 = vld [vmem:[#allocation32_spill] sm:$0xff]  ;;  %v2549_v42 = vld [vmem:[#allocation35_spill] sm:$0xff]  ;;  %v2557_v10 = vld [vmem:[#allocation21_spill] sm:$0xff] }
 0x22e   : > { %1026 = vst [vmem:[%s1689_s10] sm:$0xff] %v994_v29  ;;  %v965_v35 = vmul.f32 %v2263_v15, %v2546_v24  ;;  %v1000_v23 = vadd.f32 %v2261_v14, %v962_v26  ;;  %v966_v36 = vmul.f32 %v2259_v13, %v2547_v20  ;;  %v967_v39 = vmul.f32 %v2263_v15, %v2548_v37  ;;  %v2550_v45 = vld [vmem:[#allocation36_spill] sm:$0xff]  ;;  %v2551_v48 = vld [vmem:[#allocation39_spill] sm:$0xff]  ;;  %v2558_v17 = vld [vmem:[#allocation22_spill] sm:$0xff] }
 0x22f   : > { %1027 = vst [vmem:[%s1689_s10 + $0x8] sm:$0xff] %v995_v21  ;;  %v1001_v19 = vadd.f32 %v2265_v16, %v963_v32  ;;  %v1002_v40 = vadd.f32 %v2261_v14, %v964_v27  ;;  %v968_v43 = vmul.f32 %v2259_v13, %v2549_v42  ;;  %v969_v46 = vmul.f32 %v2263_v15, %v2550_v45  ;;  %v2552_v59 = vld [vmem:[#allocation40_spill] sm:$0xff]  ;;  %v2559_v52 = vld [vmem:[#allocation25_spill] sm:$0xff]  ;;  %v2560_v55 = vld [vmem:[#allocation26_spill] sm:$0xff] }
 0x230   : > { %1028 = vst [vmem:[%s1689_s10 + $0x10] sm:$0xff] %v996_v22  ;;  %v1003_v44 = vadd.f32 %v2265_v16, %v965_v35  ;;  %v1004_v47 = vadd.f32 %v2261_v14, %v966_v36  ;;  %v970_v57 = vmul.f32 %v2259_v13, %v2551_v48  ;;  %v1005_v58 = vadd.f32 %v2265_v16, %v967_v39  ;;  %v2561_v50 = vld [vmem:[#allocation29_spill] sm:$0xff]  ;;  %v2562_v29 = vld [vmem:[#allocation30_spill] sm:$0xff] }
 0x231   : > { %1029 = vst [vmem:[%s1689_s10 + $0x18] sm:$0xff] %v997_v30  ;;  %v971_v60 = vmul.f32 %v2263_v15, %v2552_v59  ;;  %v1006_v61 = vadd.f32 %v2261_v14, %v968_v43  ;;  %v1007_v0 = vadd.f32 %v2265_v16, %v969_v46  ;;  %v973_v2 = vmul.f32 %v2263_v15, %v2554_v1  ;;  %v2563_v25 = vld [vmem:[#allocation33_spill] sm:$0xff]  ;;  %v2564_v31 = vld [vmem:[#allocation34_spill] sm:$0xff] }
 0x232   : > { %1030 = vst [vmem:[%s1689_s10 + $0x20] sm:$0xff] %v998_v28  ;;  %v1008_v5 = vadd.f32 %v2261_v14, %v970_v57  ;;  %v974_v4 = vmul.f32 %v2259_v13, %v2555_v3  ;;  %v975_v8 = vmul.f32 %v2263_v15, %v2556_v7  ;;  %v1010_v9 = vadd.f32 %v2261_v14, %v972_v63  ;;  %v2565_v33 = vld [vmem:[#allocation37_spill] sm:$0xff]  ;;  %v2566_v24 = vld [vmem:[#allocation38_spill] sm:$0xff] }
 0x233   : > { %1031 = vst [vmem:[%s1689_s10 + $0x28] sm:$0xff] %v999_v34  ;;  %v1009_v6 = vadd.f32 %v2265_v16, %v971_v60  ;;  %v976_v11 = vmul.f32 %v2259_v13, %v2557_v10  ;;  %v1011_v12 = vadd.f32 %v2265_v16, %v973_v2  ;;  %v977_v18 = vmul.f32 %v2263_v15, %v2558_v17  ;;  %v2567_v20 = vld [vmem:[#allocation41_spill] sm:$0xff]  ;;  %v2568_v37 = vld [vmem:[#allocation42_spill] sm:$0xff] }
 0x234   : > { %1032 = vst [vmem:[%s1689_s10 + $0x30] sm:$0xff] %v1000_v23  ;;  %v1012_v51 = vadd.f32 %v2261_v14, %v974_v4  ;;  %v978_v53 = vmul.f32 %v2259_v13, %v2559_v52  ;;  %v1013_v54 = vadd.f32 %v2265_v16, %v975_v8  ;;  %v979_v56 = vmul.f32 %v2263_v15, %v2560_v55 }
 0x235   : > { %1033 = vst [vmem:[%s1689_s10 + $0x38] sm:$0xff] %v1001_v19  ;;  %v1014_v49 = vadd.f32 %v2261_v14, %v976_v11  ;;  %v980_v41 = vmul.f32 %v2259_v13, %v2561_v50  ;;  %v1015_v38 = vadd.f32 %v2265_v16, %v977_v18  ;;  %v981_v21 = vmul.f32 %v2263_v15, %v2562_v29 }
 0x236   : > { %1034 = vst [vmem:[%s1689_s10 + $0x40] sm:$0xff] %v1002_v40  ;;  %v1016_v22 = vadd.f32 %v2261_v14, %v978_v53  ;;  %v982_v26 = vmul.f32 %v2259_v13, %v2563_v25  ;;  %v1017_v30 = vadd.f32 %v2265_v16, %v979_v56  ;;  %v983_v32 = vmul.f32 %v2263_v15, %v2564_v31 }
 0x237   : > { %1035 = vst [vmem:[%s1689_s10 + $0x48] sm:$0xff] %v1003_v44  ;;  %v1018_v28 = vadd.f32 %v2261_v14, %v980_v41  ;;  %v984_v27 = vmul.f32 %v2259_v13, %v2565_v33  ;;  %v1019_v34 = vadd.f32 %v2265_v16, %v981_v21  ;;  %v985_v35 = vmul.f32 %v2263_v15, %v2566_v24 }
 0x238   : > { %1036 = vst [vmem:[%s1689_s10 + $0x50] sm:$0xff] %v1004_v47  ;;  %v1020_v23 = vadd.f32 %v2261_v14, %v982_v26  ;;  %v986_v36 = vmul.f32 %v2259_v13, %v2567_v20  ;;  %v1021_v19 = vadd.f32 %v2265_v16, %v983_v32  ;;  %v987_v39 = vmul.f32 %v2263_v15, %v2568_v37 }
 0x239   : > { %1037 = vst [vmem:[%s1689_s10 + $0x58] sm:$0xff] %v1005_v58  ;;  %v1022_v40 = vadd.f32 %v2261_v14, %v984_v27  ;;  %v1023_v42 = vadd.f32 %v2265_v16, %v985_v35 }
 0x23a   : > { %1038 = vst [vmem:[%s1689_s10 + $0x60] sm:$0xff] %v1006_v61  ;;  %v1024_v43 = vadd.f32 %v2261_v14, %v986_v36  ;;  %v1025_v44 = vadd.f32 %v2265_v16, %v987_v39 }
 0x23b   : > { %1039 = vst [vmem:[%s1689_s10 + $0x68] sm:$0xff] %v1007_v0 }
 0x23c   : > { %1040 = vst [vmem:[%s1689_s10 + $0x70] sm:$0xff] %v1008_v5 }
 0x23d   : > { %1041 = vst [vmem:[%s1689_s10 + $0x78] sm:$0xff] %v1009_v6 }
 0x23e   : > { %1042 = vst [vmem:[%s1689_s10 + $0x80] sm:$0xff] %v1010_v9 }
 0x23f   : > { %1043 = vst [vmem:[%s1689_s10 + $0x88] sm:$0xff] %v1011_v12 }
 0x240   : > { %1044 = vst [vmem:[%s1689_s10 + $0x90] sm:$0xff] %v1012_v51 }
 0x241   : > { %1045 = vst [vmem:[%s1689_s10 + $0x98] sm:$0xff] %v1013_v54 }
 0x242   : > { %1046 = vst [vmem:[%s1689_s10 + $0xa0] sm:$0xff] %v1014_v49 }
 0x243   : > { %1047 = vst [vmem:[%s1689_s10 + $0xa8] sm:$0xff] %v1015_v38 }
 0x244   : > { %1048 = vst [vmem:[%s1689_s10 + $0xb0] sm:$0xff] %v1016_v22 }
 0x245   : > { %1049 = vst [vmem:[%s1689_s10 + $0xb8] sm:$0xff] %v1017_v30 }
 0x246   : > { %1050 = vst [vmem:[%s1689_s10 + $0xc0] sm:$0xff] %v1018_v28 }
 0x247   : > { %1051 = vst [vmem:[%s1689_s10 + $0xc8] sm:$0xff] %v1019_v34 }
 0x248   : > { %1052 = vst [vmem:[%s1689_s10 + $0xd0] sm:$0xff] %v1020_v23 }
 0x249   : > { %1053 = vst [vmem:[%s1689_s10 + $0xd8] sm:$0xff] %v1021_v19 }
 0x24a   : > { %1054 = vst [vmem:[%s1689_s10 + $0xe0] sm:$0xff] %v1022_v40 }
 0x24b   : > { %1055 = vst [vmem:[%s1689_s10 + $0xe8] sm:$0xff] %v1023_v42 }
 0x24c   : > { %1056 = vst [vmem:[%s1689_s10 + $0xf0] sm:$0xff] %v1024_v43 }
 0x24d   : > { %1057 = vst [vmem:[%s1689_s10 + $0xf8] sm:$0xff] %v1025_v44 }
 0x24e PF: > { %s1066_s8 = smul.u32 %s1401_s24, %s1405_s25  ;;  %s1214_s11 = sshll.u32 %s1409_s26, 6 }
 0x24f   : > { %s1075_s12 = sshll.u32 %s1689_s10, 4  ;;  %s2569_s1 = sand.u32 1, %s1393_s22   ;;  %s1076_s12 = int_to_ptr.vmem [resolvable:$true] %s1075_s12 }
 0x250   : > { %s1218_s16 = sshll.u32 %s1066_s8, 5  ;;  %s1059_s2 = scalar_lea.sflag [#allocation7], %s2569_s1 }
 0x251   : > { %s1072_s17 = sadd.s32 %s1218_s16, %s1214_s11  ;;  %s1335_s26 = scalar_lea.hbm %s2454_s6, 1024 }
 0x252   : > { %s1215_s18 = sshll.u32 %s1072_s17, 3 }
 0x253   : > { %s1074_s14 = scalar_lea.hbm %s2454_s6, %s1215_s18 }
 0x254   : > { %s1077_s0 = sshll.u32 %s1074_s14, 4  ;;  %s1078_s0 = int_to_ptr.hbm [resolvable:$true] %s1077_s0 }
 0x255   : > { %s1329_s3 = sshra.s32 %s1078_s0, 4  ;;  %s1330_s3 = int_to_ptr.hbm [resolvable:$true] %s1329_s3 }
 0x256   : > { %s1331_s4 = scalar_lea.hbm %s1330_s3, 256  ;;  %p1336_p13 = scmp.lt.s32.totalorder %s1330_s3, %s2454_s6 }
 0x257   : > { %p1332_p10 = scmp.ne.s32.totalorder %s1330_s3, %s1331_s4  ;;  %p1337_p0 = scmp.lt.s32.totalorder %s1335_s26, %s1331_s4 }
 0x259   : > { %p1333_p11 = pnand %p1332_p10, %p1529_p5  ;;  %p1338_p1 = por %p1337_p0, %p1336_p13 }
 0x25b   : > { %p1334_p12 = pneg %p1333_p11 }
 0x25d   : > { %p1339_p2 = pnand %p1338_p1, %p1334_p12 }
 0x25f   : > { %1342 = shalt.err (!%p1339_p2)
}
 0x260   : > { %s1428_s1 = smov 256   ;;  %s1429_s14 = smov 16  }
 0x261   : > { %1221 = dma.vmem_to_hbm [thread:$0]  (%p1529_p5), %s1076_s12, 4096, %s1078_s0, %s1059_s2, %s1428_s1, %s1428_s1, %s1429_s14  }
 0x262 PF: > { %p1227_p3 = scmp.ge.s32.totalorder %s1425_s30, 2  ;;  %s1092_s11 = sand.u32 1, %s1389_s21  }
 0x263   : > { %s1093_s16 = scalar_lea.sflag [#allocation7], %s1092_s11 }
 0x264   : > { %p1224_p4 = pnand %p1227_p3, %p1538_p7 }
 0x266   : > { %p1225_p6 = pneg %p1224_p4 }
 0x268   : > { %1384 = dma.done.wait (%p1225_p6), %s1093_s16, 4096  }
 0x269   : > { %1386 = vsyncadd (%p1225_p6), %s1093_s16, 4294963200  ;;  %s19_s30 = sadd.s32 1, %s1425_s30   ;;  %s2570_s0 = sld [smem:[#allocation9_spill]] }
 0x26a   : > { %p16_p8 = scmp.ge.s32.totalorder %s19_s30, 10   ;;  %s2571_s2 = sld [smem:[#allocation10_spill]] }
 0x26b   : > { %s2572_s21 = smov %s1393_s22  ;;  %s2573_s22 = smov %s1397_s23 }
 0x26c   : > { %s2574_s23 = smov %s1550_s20  ;;  %s2575_s24 = smov %s1413_s27 }
 0x26d   : > { %s2576_s25 = smov %s1417_s28  ;;  %s2577_s26 = smov %s1421_s29 }
 0x26e   : > { %s2578_s27 = smov %s2582_s9  ;;  %18 = sbr.rel (!%p16_p8) target bundleno = 12 (0xc), region = 95 }
 0x26f   : > { %s2579_s28 = smov %s2570_s0 }
 0x270   : > { %s2580_s29 = smov %s2571_s2 }
 0x273   :  { %1099 = vsyncpa [#allocation7], 1 }
 0x274   :  { %1101 = vsyncpa [#allocation7 + $0x1], 1 }

</bundles_post_ra>
